<compile_context>
chip_gen: v6e
topology: v6e:2x2x1
jax: 0.10.0
libtpu: 0.0.40
codegen_flags: <defaults>
</compile_context>

<pallas_src>
import jax
import jax.numpy as jnp
from jax.experimental import pallas as pl
from jax.experimental.pallas import tpu as pltpu

# ----------------------------- config (small) -------------------------------
VOCAB = 50
D_MODEL = 32
N_HEADS = 4
D_HEAD = D_MODEL // N_HEADS
FFN_DIM = 64
N_LAYERS = 2
LN_EPS = 1e-5  # PyTorch nn.LayerNorm default
NEG_INF = -1e30


# ------------------------------ shared math ---------------------------------
def _layernorm(x, g, b):
    mu = jnp.mean(x, axis=-1, keepdims=True)
    var = jnp.mean((x - mu) ** 2, axis=-1, keepdims=True)
    return (x - mu) * jax.lax.rsqrt(var + LN_EPS) * g + b


# ------------------------------- Pallas kernel ------------------------------
def roformer_kernel(x_ref, rope_ref, mask_ref, rmat_ref,
                    wqkv_ref, wo_ref, w1_ref, w2_ref, vec_ref, o_ref):
    x = x_ref[...]               # (B*S, D)
    cos = rope_ref[0]            # (B*S, D)
    sin = rope_ref[1]            # (B*S, D)
    mask = mask_ref[...]         # (B*S, B*S) block-diagonal additive mask
    rmat = rmat_ref[...]         # (D, D)  rotate_half as a linear operator
    scale = 1.0 / (D_HEAD ** 0.5)

    for l in range(N_LAYERS):    # static unroll, N_LAYERS is tiny
        wqkv = wqkv_ref[l]       # (D, 3D)
        wo = wo_ref[l]           # (D, D)
        w1 = w1_ref[l]           # (D, FFN)
        w2 = w2_ref[l]           # (FFN, D)
        vec = vec_ref[l]         # (8, 3D) packed biases + LN params
        b_qkv = vec[0:1, :]
        b_o = vec[1:2, :D_MODEL]
        b_1 = vec[2:3, :FFN_DIM]
        b_2 = vec[3:4, :D_MODEL]
        g1 = vec[4:5, :D_MODEL]
        be1 = vec[5:6, :D_MODEL]
        g2 = vec[6:7, :D_MODEL]
        be2 = vec[7:8, :D_MODEL]

        # --- fused QKV projection
        qkv = jnp.dot(x, wqkv, preferred_element_type=jnp.float32) + b_qkv
        q = qkv[:, 0:D_MODEL]
        k = qkv[:, D_MODEL:2 * D_MODEL]
        v = qkv[:, 2 * D_MODEL:3 * D_MODEL]

        # --- rotary position embedding (half-split convention) via matmul
        q = q * cos + jnp.dot(q, rmat, preferred_element_type=jnp.float32) * sin
        k = k * cos + jnp.dot(k, rmat, preferred_element_type=jnp.float32) * sin

        # --- multi-head attention (whole batch at once, block-diag mask)
        # TODO(synk): additive attention_mask support (forward exercised with mask=None)
        heads = []
        for h in range(N_HEADS):             # static unroll, N_HEADS is small
            sl = slice(h * D_HEAD, (h + 1) * D_HEAD)
            s = jnp.dot(q[:, sl], k[:, sl].T,
                        preferred_element_type=jnp.float32) * scale + mask
            s = s - jnp.max(s, axis=-1, keepdims=True)
            p = jnp.exp(s)
            p = p * pl.reciprocal(jnp.sum(p, axis=-1, keepdims=True), approx=True)
            heads.append(jnp.dot(p, v[:, sl], preferred_element_type=jnp.float32))
        attn = jnp.concatenate(heads, axis=-1)                      # (B*S, D)
        attn = jnp.dot(attn, wo, preferred_element_type=jnp.float32) + b_o

        # residual + dropout1 (eval: identity) + LayerNorm
        x = _layernorm(x + attn, g1, be1)

        # --- FFN: Linear -> ReLU -> Linear
        h1 = jnp.maximum(jnp.dot(x, w1, preferred_element_type=jnp.float32) + b_1, 0.0)
        ffn = jnp.dot(h1, w2, preferred_element_type=jnp.float32) + b_2

        # residual + dropout2 (eval: identity) + LayerNorm
        x = _layernorm(x + ffn, g2, be2)

    o_ref[...] = x


# ------------------------------- host helpers -------------------------------
def make_rope_tables(seq_len, d_head):
    half = d_head // 2
    inv_freq = 1.0 / (10000.0 ** (jnp.arange(half, dtype=jnp.float32) / half))
    pos = jnp.arange(seq_len, dtype=jnp.float32)
    ang = pos[:, None] * inv_freq[None, :]                        # (S, half)
    sin = jnp.concatenate([jnp.sin(ang), jnp.sin(ang)], axis=-1)  # (S, d_head)
    cos = jnp.concatenate([jnp.cos(ang), jnp.cos(ang)], axis=-1)
    return sin, cos


def make_rotate_half_matrix():
    # rotate_half(x) == x @ R   with R block-diagonal over heads,
    # each block mapping (x1, x2) -> (-x2, x1).
    half = D_HEAD // 2
    idx = jnp.arange(half)
    blk = jnp.zeros((D_HEAD, D_HEAD), jnp.float32)
    blk = blk.at[half + idx, idx].set(-1.0)   # out[:half] = -x[half:]
    blk = blk.at[idx, half + idx].set(1.0)    # out[half:] =  x[:half]
    return jnp.kron(jnp.eye(N_HEADS, dtype=jnp.float32), blk)      # (D, D)


def _prepare_inputs(input_ids, emb):
    B, S = input_ids.shape
    x = jnp.take(emb, input_ids, axis=0).astype(jnp.float32).reshape(B * S, D_MODEL)
    sin, cos = make_rope_tables(S, D_HEAD)
    rope = jnp.stack([jnp.tile(cos, (B, N_HEADS)),
                      jnp.tile(sin, (B, N_HEADS))])                 # (2, B*S, D)
    bidx = jnp.repeat(jnp.arange(B), S)
    mask = jnp.where(bidx[:, None] == bidx[None, :], 0.0, NEG_INF).astype(jnp.float32)
    rmat = make_rotate_half_matrix()
    return x, rope, mask, rmat


@jax.jit
def roformer_decoder(input_ids, emb, packed):
    B, S = input_ids.shape
    x, rope, mask, rmat = _prepare_inputs(input_ids, emb)
    wqkv_s, wo_s, w1_s, w2_s, vec_s = packed
    vmem = lambda: pl.BlockSpec(memory_space=pltpu.MemorySpace.VMEM)
    out = pl.pallas_call(
        roformer_kernel,
        out_shape=jax.ShapeDtypeStruct((B * S, D_MODEL), jnp.float32),
        in_specs=[vmem() for _ in range(9)],
        out_specs=vmem(),
    )(x, rope, mask, rmat, wqkv_s, wo_s, w1_s, w2_s, vec_s)
    return out.reshape(B, S, D_MODEL)


def init_params(key):
    def linear(key, fan_in, fan_out):
        k1, k2 = jax.random.split(key)
        bound = 1.0 / (fan_in ** 0.5)
        w = jax.random.uniform(k1, (fan_in, fan_out), jnp.float32, -bound, bound)
        b = jax.random.uniform(k2, (1, fan_out), jnp.float32, -bound, bound)
        return w, b

    key, k_emb = jax.random.split(key)
    emb = jax.random.normal(k_emb, (VOCAB, D_MODEL), jnp.float32)

    def pad_row(v):  # (1, n) -> (3*D_MODEL,)
        return jnp.pad(v[0], (0, 3 * D_MODEL - v.shape[1]))

    wqkv_l, wo_l, w1_l, w2_l, vec_l = [], [], [], [], []
    for _ in range(N_LAYERS):
        key, kq, kk, kv, ko, k1, k2 = jax.random.split(key, 7)
        wq, bq = linear(kq, D_MODEL, D_MODEL)
        wk, bk = linear(kk, D_MODEL, D_MODEL)
        wv, bv = linear(kv, D_MODEL, D_MODEL)
        wo, bo = linear(ko, D_MODEL, D_MODEL)
        w1, b1 = linear(k1, D_MODEL, FFN_DIM)
        w2, b2 = linear(k2, FFN_DIM, D_MODEL)
        ln1g = jnp.ones((1, D_MODEL), jnp.float32)
        ln1b = jnp.zeros((1, D_MODEL), jnp.float32)
        ln2g = jnp.ones((1, D_MODEL), jnp.float32)
        ln2b = jnp.zeros((1, D_MODEL), jnp.float32)

        wqkv_l.append(jnp.concatenate([wq, wk, wv], axis=1))
        wo_l.append(wo)
        w1_l.append(w1)
        w2_l.append(w2)
        bqkv = jnp.concatenate([bq, bk, bv], axis=1)
        vec_l.append(jnp.stack([pad_row(bqkv), pad_row(bo), pad_row(b1), pad_row(b2),
                                pad_row(ln1g), pad_row(ln1b), pad_row(ln2g), pad_row(ln2b)]))

    packed = (jnp.stack(wqkv_l), jnp.stack(wo_l), jnp.stack(w1_l),
              jnp.stack(w2_l), jnp.stack(vec_l))
    return emb, packed


# ------------------------- pure-JAX reference (sanity) -----------------------
def reference_forward(x, rope, mask, rmat, packed):
    hi = jax.lax.Precision.HIGHEST
    cos, sin = rope[0], rope[1]
    wqkv_s, wo_s, w1_s, w2_s, vec_s = packed
    scale = 1.0 / (D_HEAD ** 0.5)
    for l in range(N_LAYERS):
        wqkv, wo, w1, w2, vec = wqkv_s[l], wo_s[l], w1_s[l], w2_s[l], vec_s[l]
        b_qkv = vec[0:1, :]
        b_o = vec[1:2, :D_MODEL]
        b_1 = vec[2:3, :FFN_DIM]
        b_2 = vec[3:4, :D_MODEL]
        g1, be1 = vec[4:5, :D_MODEL], vec[5:6, :D_MODEL]
        g2, be2 = vec[6:7, :D_MODEL], vec[7:8, :D_MODEL]

        qkv = jnp.dot(x, wqkv, precision=hi) + b_qkv
        q = qkv[:, 0:D_MODEL]
        k = qkv[:, D_MODEL:2 * D_MODEL]
        v = qkv[:, 2 * D_MODEL:3 * D_MODEL]
        q = q * cos + jnp.dot(q, rmat, precision=hi) * sin
        k = k * cos + jnp.dot(k, rmat, precision=hi) * sin
        heads = []
        for h in range(N_HEADS):
            sl = slice(h * D_HEAD, (h + 1) * D_HEAD)
            s = jnp.dot(q[:, sl], k[:, sl].T, precision=hi) * scale + mask
            p = jax.nn.softmax(s, axis=-1)
            heads.append(jnp.dot(p, v[:, sl], precision=hi))
        attn = jnp.dot(jnp.concatenate(heads, axis=-1), wo, precision=hi) + b_o
        x = _layernorm(x + attn, g1, be1)
        h1 = jnp.maximum(jnp.dot(x, w1, precision=hi) + b_1, 0.0)
        ffn = jnp.dot(h1, w2, precision=hi) + b_2
        x = _layernorm(x + ffn, g2, be2)
    return x


# ----------------------------------- main ------------------------------------
if __name__ == "__main__":
    key = jax.random.PRNGKey(0)
    B, S = 2, 8
    key, k_ids = jax.random.split(key)
    input_ids = jax.random.randint(k_ids, (B, S), 0, VOCAB, dtype=jnp.int32)

    emb, packed = init_params(key)
    out = roformer_decoder(input_ids, emb, packed)
    jax.block_until_ready(out)
    assert out.shape == (B, S, D_MODEL)
    assert bool(jnp.all(jnp.isfinite(out)))

    # loose sanity check of the Pallas path against a pure-JAX reference
    x0, rope, mask, rmat = _prepare_inputs(input_ids, emb)
    ref = reference_forward(x0, rope, mask, rmat, packed).reshape(B, S, D_MODEL)
    assert bool(jnp.allclose(out, ref, atol=5e-2, rtol=5e-2))

    print("KERNEL_OK")
</pallas_src>

<mosaic_0001>
module attributes {stable_mosaic.version = 11 : i64} {
  func.func @roformer_kernel(%arg0: memref<16x32xf32, #tpu.memory_space<vmem>>, %arg1: memref<2x16x32xf32, #tpu.memory_space<vmem>>, %arg2: memref<16x16xf32, #tpu.memory_space<vmem>>, %arg3: memref<32x32xf32, #tpu.memory_space<vmem>>, %arg4: memref<2x32x96xf32, #tpu.memory_space<vmem>>, %arg5: memref<2x32x32xf32, #tpu.memory_space<vmem>>, %arg6: memref<2x32x64xf32, #tpu.memory_space<vmem>>, %arg7: memref<2x64x32xf32, #tpu.memory_space<vmem>>, %arg8: memref<2x8x96xf32, #tpu.memory_space<vmem>>, %arg9: memref<16x32xf32, #tpu.memory_space<vmem>>) attributes {dimension_semantics = [], scalar_prefetch = 0 : i64, scratch_operands = 0 : i64, tpu.core_type = #tpu.core_type<tc>} {
    %c0 = arith.constant 0 : index
    %c0_0 = arith.constant 0 : index
    %0 = vector.load %arg0[%c0, %c0_0] : memref<16x32xf32, #tpu.memory_space<vmem>>, vector<16x32xf32>
    %c0_1 = arith.constant 0 : index
    %c0_2 = arith.constant 0 : index
    %c0_3 = arith.constant 0 : index
    %1 = vector.load %arg1[%c0_1, %c0_2, %c0_3] : memref<2x16x32xf32, #tpu.memory_space<vmem>>, vector<1x16x32xf32>
    %2 = vector.shape_cast %1 : vector<1x16x32xf32> to vector<16x32xf32>
    %c1 = arith.constant 1 : index
    %c0_4 = arith.constant 0 : index
    %c0_5 = arith.constant 0 : index
    %3 = vector.load %arg1[%c1, %c0_4, %c0_5] : memref<2x16x32xf32, #tpu.memory_space<vmem>>, vector<1x16x32xf32>
    %4 = vector.shape_cast %3 : vector<1x16x32xf32> to vector<16x32xf32>
    %c0_6 = arith.constant 0 : index
    %c0_7 = arith.constant 0 : index
    %5 = vector.load %arg2[%c0_6, %c0_7] : memref<16x16xf32, #tpu.memory_space<vmem>>, vector<16x16xf32>
    %c0_8 = arith.constant 0 : index
    %c0_9 = arith.constant 0 : index
    %6 = vector.load %arg3[%c0_8, %c0_9] : memref<32x32xf32, #tpu.memory_space<vmem>>, vector<32x32xf32>
    %c0_10 = arith.constant 0 : index
    %c0_11 = arith.constant 0 : index
    %c0_12 = arith.constant 0 : index
    %7 = vector.load %arg4[%c0_10, %c0_11, %c0_12] : memref<2x32x96xf32, #tpu.memory_space<vmem>>, vector<1x32x96xf32>
    %8 = vector.shape_cast %7 : vector<1x32x96xf32> to vector<32x96xf32>
    %c0_13 = arith.constant 0 : index
    %c0_14 = arith.constant 0 : index
    %c0_15 = arith.constant 0 : index
    %9 = vector.load %arg5[%c0_13, %c0_14, %c0_15] : memref<2x32x32xf32, #tpu.memory_space<vmem>>, vector<1x32x32xf32>
    %10 = vector.shape_cast %9 : vector<1x32x32xf32> to vector<32x32xf32>
    %c0_16 = arith.constant 0 : index
    %c0_17 = arith.constant 0 : index
    %c0_18 = arith.constant 0 : index
    %11 = vector.load %arg6[%c0_16, %c0_17, %c0_18] : memref<2x32x64xf32, #tpu.memory_space<vmem>>, vector<1x32x64xf32>
    %12 = vector.shape_cast %11 : vector<1x32x64xf32> to vector<32x64xf32>
    %c0_19 = arith.constant 0 : index
    %c0_20 = arith.constant 0 : index
    %c0_21 = arith.constant 0 : index
    %13 = vector.load %arg7[%c0_19, %c0_20, %c0_21] : memref<2x64x32xf32, #tpu.memory_space<vmem>>, vector<1x64x32xf32>
    %14 = vector.shape_cast %13 : vector<1x64x32xf32> to vector<64x32xf32>
    %c0_22 = arith.constant 0 : index
    %c0_23 = arith.constant 0 : index
    %c0_24 = arith.constant 0 : index
    %15 = vector.load %arg8[%c0_22, %c0_23, %c0_24] : memref<2x8x96xf32, #tpu.memory_space<vmem>>, vector<1x8x96xf32>
    %16 = vector.shape_cast %15 : vector<1x8x96xf32> to vector<8x96xf32>
    %17 = vector.extract_strided_slice %16 {offsets = [0, 0], sizes = [1, 96], strides = [1, 1]} : vector<8x96xf32> to vector<1x96xf32>
    %18 = vector.extract_strided_slice %16 {offsets = [1, 0], sizes = [1, 32], strides = [1, 1]} : vector<8x96xf32> to vector<1x32xf32>
    %19 = vector.extract_strided_slice %16 {offsets = [2, 0], sizes = [1, 64], strides = [1, 1]} : vector<8x96xf32> to vector<1x64xf32>
    %20 = vector.extract_strided_slice %16 {offsets = [3, 0], sizes = [1, 32], strides = [1, 1]} : vector<8x96xf32> to vector<1x32xf32>
    %21 = vector.extract_strided_slice %16 {offsets = [4, 0], sizes = [1, 32], strides = [1, 1]} : vector<8x96xf32> to vector<1x32xf32>
    %22 = vector.extract_strided_slice %16 {offsets = [5, 0], sizes = [1, 32], strides = [1, 1]} : vector<8x96xf32> to vector<1x32xf32>
    %23 = vector.extract_strided_slice %16 {offsets = [6, 0], sizes = [1, 32], strides = [1, 1]} : vector<8x96xf32> to vector<1x32xf32>
    %24 = vector.extract_strided_slice %16 {offsets = [7, 0], sizes = [1, 32], strides = [1, 1]} : vector<8x96xf32> to vector<1x32xf32>
    %cst = arith.constant dense<0.000000e+00> : vector<16x96xf32>
    %25 = tpu.matmul %0, %8, %cst {dimension_numbers = #tpu.dot_dimension_numbers<[1], [0], [0], [1], [0, 0, 1, 1], [], []>} : vector<16x32xf32>, vector<32x96xf32>, vector<16x96xf32> -> vector<16x96xf32>
    %26 = vector.broadcast %17 : vector<1x96xf32> to vector<16x96xf32>
    %27 = arith.addf %25, %26 : vector<16x96xf32>
    %28 = vector.extract_strided_slice %27 {offsets = [0, 0], sizes = [16, 32], strides = [1, 1]} : vector<16x96xf32> to vector<16x32xf32>
    %29 = vector.extract_strided_slice %27 {offsets = [0, 32], sizes = [16, 32], strides = [1, 1]} : vector<16x96xf32> to vector<16x32xf32>
    %30 = vector.extract_strided_slice %27 {offsets = [0, 64], sizes = [16, 32], strides = [1, 1]} : vector<16x96xf32> to vector<16x32xf32>
    %31 = arith.mulf %28, %2 : vector<16x32xf32>
    %cst_25 = arith.constant dense<0.000000e+00> : vector<16x32xf32>
    %32 = tpu.matmul %28, %6, %cst_25 {dimension_numbers = #tpu.dot_dimension_numbers<[1], [0], [0], [1], [0, 0, 1, 1], [], []>} : vector<16x32xf32>, vector<32x32xf32>, vector<16x32xf32> -> vector<16x32xf32>
    %33 = arith.mulf %32, %4 : vector<16x32xf32>
    %34 = arith.addf %31, %33 : vector<16x32xf32>
    %35 = arith.mulf %29, %2 : vector<16x32xf32>
    %cst_26 = arith.constant dense<0.000000e+00> : vector<16x32xf32>
    %36 = tpu.matmul %29, %6, %cst_26 {dimension_numbers = #tpu.dot_dimension_numbers<[1], [0], [0], [1], [0, 0, 1, 1], [], []>} : vector<16x32xf32>, vector<32x32xf32>, vector<16x32xf32> -> vector<16x32xf32>
    %37 = arith.mulf %36, %4 : vector<16x32xf32>
    %38 = arith.addf %35, %37 : vector<16x32xf32>
    %39 = vector.extract_strided_slice %34 {offsets = [0, 0], sizes = [16, 8], strides = [1, 1]} : vector<16x32xf32> to vector<16x8xf32>
    %40 = vector.extract_strided_slice %38 {offsets = [0, 0], sizes = [16, 8], strides = [1, 1]} : vector<16x32xf32> to vector<16x8xf32>
    %41 = tpu.transpose %40, [1, 0] : vector<16x8xf32> -> vector<8x16xf32>
    %cst_27 = arith.constant dense<0.000000e+00> : vector<16x16xf32>
    %42 = tpu.matmul %39, %41, %cst_27 {dimension_numbers = #tpu.dot_dimension_numbers<[1], [0], [0], [1], [0, 0, 1, 1], [], []>} : vector<16x8xf32>, vector<8x16xf32>, vector<16x16xf32> -> vector<16x16xf32>
    %cst_28 = arith.constant 0.353553385 : f32
    %43 = vector.broadcast %cst_28 : f32 to vector<16x16xf32>
    %44 = arith.mulf %42, %43 : vector<16x16xf32>
    %45 = arith.addf %44, %5 : vector<16x16xf32>
    %cst_29 = arith.constant dense<0xFF800000> : vector<16xf32>
    %46 = vector.multi_reduction <maximumf>, %45, %cst_29 [1] : vector<16x16xf32> to vector<16xf32>
    %47 = vector.shape_cast %46 : vector<16xf32> to vector<16x1xf32>
    %48 = vector.broadcast %47 : vector<16x1xf32> to vector<16x16xf32>
    %49 = arith.subf %45, %48 : vector<16x16xf32>
    %50 = math.exp %49 : vector<16x16xf32>
    %cst_30 = arith.constant dense<0.000000e+00> : vector<16xf32>
    %51 = vector.multi_reduction <add>, %50, %cst_30 [1] : vector<16x16xf32> to vector<16xf32>
    %52 = vector.shape_cast %51 : vector<16xf32> to vector<16x1xf32>
    %53 = tpu.reciprocal %52 {approx = true} : vector<16x1xf32> -> vector<16x1xf32>
    %54 = vector.broadcast %53 : vector<16x1xf32> to vector<16x16xf32>
    %55 = arith.mulf %50, %54 : vector<16x16xf32>
    %56 = vector.extract_strided_slice %30 {offsets = [0, 0], sizes = [16, 8], strides = [1, 1]} : vector<16x32xf32> to vector<16x8xf32>
    %cst_31 = arith.constant dense<0.000000e+00> : vector<16x8xf32>
    %57 = tpu.matmul %55, %56, %cst_31 {dimension_numbers = #tpu.dot_dimension_numbers<[1], [0], [0], [1], [0, 0, 1, 1], [], []>} : vector<16x16xf32>, vector<16x8xf32>, vector<16x8xf32> -> vector<16x8xf32>
    %58 = vector.extract_strided_slice %34 {offsets = [0, 8], sizes = [16, 8], strides = [1, 1]} : vector<16x32xf32> to vector<16x8xf32>
    %59 = vector.extract_strided_slice %38 {offsets = [0, 8], sizes = [16, 8], strides = [1, 1]} : vector<16x32xf32> to vector<16x8xf32>
    %60 = tpu.transpose %59, [1, 0] : vector<16x8xf32> -> vector<8x16xf32>
    %cst_32 = arith.constant dense<0.000000e+00> : vector<16x16xf32>
    %61 = tpu.matmul %58, %60, %cst_32 {dimension_numbers = #tpu.dot_dimension_numbers<[1], [0], [0], [1], [0, 0, 1, 1], [], []>} : vector<16x8xf32>, vector<8x16xf32>, vector<16x16xf32> -> vector<16x16xf32>
    %cst_33 = arith.constant 0.353553385 : f32
    %62 = vector.broadcast %cst_33 : f32 to vector<16x16xf32>
    %63 = arith.mulf %61, %62 : vector<16x16xf32>
    %64 = arith.addf %63, %5 : vector<16x16xf32>
    %cst_34 = arith.constant dense<0xFF800000> : vector<16xf32>
    %65 = vector.multi_reduction <maximumf>, %64, %cst_34 [1] : vector<16x16xf32> to vector<16xf32>
    %66 = vector.shape_cast %65 : vector<16xf32> to vector<16x1xf32>
    %67 = vector.broadcast %66 : vector<16x1xf32> to vector<16x16xf32>
    %68 = arith.subf %64, %67 : vector<16x16xf32>
    %69 = math.exp %68 : vector<16x16xf32>
    %cst_35 = arith.constant dense<0.000000e+00> : vector<16xf32>
    %70 = vector.multi_reduction <add>, %69, %cst_35 [1] : vector<16x16xf32> to vector<16xf32>
    %71 = vector.shape_cast %70 : vector<16xf32> to vector<16x1xf32>
    %72 = tpu.reciprocal %71 {approx = true} : vector<16x1xf32> -> vector<16x1xf32>
    %73 = vector.broadcast %72 : vector<16x1xf32> to vector<16x16xf32>
    %74 = arith.mulf %69, %73 : vector<16x16xf32>
    %75 = vector.extract_strided_slice %30 {offsets = [0, 8], sizes = [16, 8], strides = [1, 1]} : vector<16x32xf32> to vector<16x8xf32>
    %cst_36 = arith.constant dense<0.000000e+00> : vector<16x8xf32>
    %76 = tpu.matmul %74, %75, %cst_36 {dimension_numbers = #tpu.dot_dimension_numbers<[1], [0], [0], [1], [0, 0, 1, 1], [], []>} : vector<16x16xf32>, vector<16x8xf32>, vector<16x8xf32> -> vector<16x8xf32>
    %77 = vector.extract_strided_slice %34 {offsets = [0, 16], sizes = [16, 8], strides = [1, 1]} : vector<16x32xf32> to vector<16x8xf32>
    %78 = vector.extract_strided_slice %38 {offsets = [0, 16], sizes = [16, 8], strides = [1, 1]} : vector<16x32xf32> to vector<16x8xf32>
    %79 = tpu.transpose %78, [1, 0] : vector<16x8xf32> -> vector<8x16xf32>
    %cst_37 = arith.constant dense<0.000000e+00> : vector<16x16xf32>
    %80 = tpu.matmul %77, %79, %cst_37 {dimension_numbers = #tpu.dot_dimension_numbers<[1], [0], [0], [1], [0, 0, 1, 1], [], []>} : vector<16x8xf32>, vector<8x16xf32>, vector<16x16xf32> -> vector<16x16xf32>
    %cst_38 = arith.constant 0.353553385 : f32
    %81 = vector.broadcast %cst_38 : f32 to vector<16x16xf32>
    %82 = arith.mulf %80, %81 : vector<16x16xf32>
    %83 = arith.addf %82, %5 : vector<16x16xf32>
    %cst_39 = arith.constant dense<0xFF800000> : vector<16xf32>
    %84 = vector.multi_reduction <maximumf>, %83, %cst_39 [1] : vector<16x16xf32> to vector<16xf32>
    %85 = vector.shape_cast %84 : vector<16xf32> to vector<16x1xf32>
    %86 = vector.broadcast %85 : vector<16x1xf32> to vector<16x16xf32>
    %87 = arith.subf %83, %86 : vector<16x16xf32>
    %88 = math.exp %87 : vector<16x16xf32>
    %cst_40 = arith.constant dense<0.000000e+00> : vector<16xf32>
    %89 = vector.multi_reduction <add>, %88, %cst_40 [1] : vector<16x16xf32> to vector<16xf32>
    %90 = vector.shape_cast %89 : vector<16xf32> to vector<16x1xf32>
    %91 = tpu.reciprocal %90 {approx = true} : vector<16x1xf32> -> vector<16x1xf32>
    %92 = vector.broadcast %91 : vector<16x1xf32> to vector<16x16xf32>
    %93 = arith.mulf %88, %92 : vector<16x16xf32>
    %94 = vector.extract_strided_slice %30 {offsets = [0, 16], sizes = [16, 8], strides = [1, 1]} : vector<16x32xf32> to vector<16x8xf32>
    %cst_41 = arith.constant dense<0.000000e+00> : vector<16x8xf32>
    %95 = tpu.matmul %93, %94, %cst_41 {dimension_numbers = #tpu.dot_dimension_numbers<[1], [0], [0], [1], [0, 0, 1, 1], [], []>} : vector<16x16xf32>, vector<16x8xf32>, vector<16x8xf32> -> vector<16x8xf32>
    %96 = vector.extract_strided_slice %34 {offsets = [0, 24], sizes = [16, 8], strides = [1, 1]} : vector<16x32xf32> to vector<16x8xf32>
    %97 = vector.extract_strided_slice %38 {offsets = [0, 24], sizes = [16, 8], strides = [1, 1]} : vector<16x32xf32> to vector<16x8xf32>
    %98 = tpu.transpose %97, [1, 0] : vector<16x8xf32> -> vector<8x16xf32>
    %cst_42 = arith.constant dense<0.000000e+00> : vector<16x16xf32>
    %99 = tpu.matmul %96, %98, %cst_42 {dimension_numbers = #tpu.dot_dimension_numbers<[1], [0], [0], [1], [0, 0, 1, 1], [], []>} : vector<16x8xf32>, vector<8x16xf32>, vector<16x16xf32> -> vector<16x16xf32>
    %cst_43 = arith.constant 0.353553385 : f32
    %100 = vector.broadcast %cst_43 : f32 to vector<16x16xf32>
    %101 = arith.mulf %99, %100 : vector<16x16xf32>
    %102 = arith.addf %101, %5 : vector<16x16xf32>
    %cst_44 = arith.constant dense<0xFF800000> : vector<16xf32>
    %103 = vector.multi_reduction <maximumf>, %102, %cst_44 [1] : vector<16x16xf32> to vector<16xf32>
    %104 = vector.shape_cast %103 : vector<16xf32> to vector<16x1xf32>
    %105 = vector.broadcast %104 : vector<16x1xf32> to vector<16x16xf32>
    %106 = arith.subf %102, %105 : vector<16x16xf32>
    %107 = math.exp %106 : vector<16x16xf32>
    %cst_45 = arith.constant dense<0.000000e+00> : vector<16xf32>
    %108 = vector.multi_reduction <add>, %107, %cst_45 [1] : vector<16x16xf32> to vector<16xf32>
    %109 = vector.shape_cast %108 : vector<16xf32> to vector<16x1xf32>
    %110 = tpu.reciprocal %109 {approx = true} : vector<16x1xf32> -> vector<16x1xf32>
    %111 = vector.broadcast %110 : vector<16x1xf32> to vector<16x16xf32>
    %112 = arith.mulf %107, %111 : vector<16x16xf32>
    %113 = vector.extract_strided_slice %30 {offsets = [0, 24], sizes = [16, 8], strides = [1, 1]} : vector<16x32xf32> to vector<16x8xf32>
    %cst_46 = arith.constant dense<0.000000e+00> : vector<16x8xf32>
    %114 = tpu.matmul %112, %113, %cst_46 {dimension_numbers = #tpu.dot_dimension_numbers<[1], [0], [0], [1], [0, 0, 1, 1], [], []>} : vector<16x16xf32>, vector<16x8xf32>, vector<16x8xf32> -> vector<16x8xf32>
    %115 = tpu.concatenate %57, %76, %95, %114 in 1 : vector<16x8xf32>, vector<16x8xf32>, vector<16x8xf32>, vector<16x8xf32> -> vector<16x32xf32>
    %cst_47 = arith.constant dense<0.000000e+00> : vector<16x32xf32>
    %116 = tpu.matmul %115, %10, %cst_47 {dimension_numbers = #tpu.dot_dimension_numbers<[1], [0], [0], [1], [0, 0, 1, 1], [], []>} : vector<16x32xf32>, vector<32x32xf32>, vector<16x32xf32> -> vector<16x32xf32>
    %117 = vector.broadcast %18 : vector<1x32xf32> to vector<16x32xf32>
    %118 = arith.addf %116, %117 : vector<16x32xf32>
    %119 = arith.addf %0, %118 : vector<16x32xf32>
    %cst_48 = arith.constant dense<0.000000e+00> : vector<16xf32>
    %120 = vector.multi_reduction <add>, %119, %cst_48 [1] : vector<16x32xf32> to vector<16xf32>
    %121 = vector.shape_cast %120 : vector<16xf32> to vector<16x1xf32>
    %cst_49 = arith.constant 3.200000e+01 : f32
    %122 = vector.broadcast %cst_49 : f32 to vector<16x1xf32>
    %123 = arith.divf %121, %122 : vector<16x1xf32>
    %124 = vector.broadcast %123 : vector<16x1xf32> to vector<16x32xf32>
    %125 = arith.subf %119, %124 : vector<16x32xf32>
    %126 = arith.mulf %125, %125 : vector<16x32xf32>
    %cst_50 = arith.constant dense<0.000000e+00> : vector<16xf32>
    %127 = vector.multi_reduction <add>, %126, %cst_50 [1] : vector<16x32xf32> to vector<16xf32>
    %128 = vector.shape_cast %127 : vector<16xf32> to vector<16x1xf32>
    %cst_51 = arith.constant 3.200000e+01 : f32
    %129 = vector.broadcast %cst_51 : f32 to vector<16x1xf32>
    %130 = arith.divf %128, %129 : vector<16x1xf32>
    %131 = vector.broadcast %123 : vector<16x1xf32> to vector<16x32xf32>
    %132 = arith.subf %119, %131 : vector<16x32xf32>
    %cst_52 = arith.constant 9.99999974E-6 : f32
    %133 = vector.broadcast %cst_52 : f32 to vector<16x1xf32>
    %134 = arith.addf %130, %133 : vector<16x1xf32>
    %135 = math.rsqrt %134 : vector<16x1xf32>
    %136 = vector.broadcast %135 : vector<16x1xf32> to vector<16x32xf32>
    %137 = arith.mulf %132, %136 : vector<16x32xf32>
    %138 = vector.broadcast %21 : vector<1x32xf32> to vector<16x32xf32>
    %139 = arith.mulf %137, %138 : vector<16x32xf32>
    %140 = vector.broadcast %22 : vector<1x32xf32> to vector<16x32xf32>
    %141 = arith.addf %139, %140 : vector<16x32xf32>
    %cst_53 = arith.constant dense<0.000000e+00> : vector<16x64xf32>
    %142 = tpu.matmul %141, %12, %cst_53 {dimension_numbers = #tpu.dot_dimension_numbers<[1], [0], [0], [1], [0, 0, 1, 1], [], []>} : vector<16x32xf32>, vector<32x64xf32>, vector<16x64xf32> -> vector<16x64xf32>
    %143 = vector.broadcast %19 : vector<1x64xf32> to vector<16x64xf32>
    %144 = arith.addf %142, %143 : vector<16x64xf32>
    %cst_54 = arith.constant 0.000000e+00 : f32
    %145 = vector.broadcast %cst_54 : f32 to vector<16x64xf32>
    %146 = arith.maximumf %144, %145 : vector<16x64xf32>
    %cst_55 = arith.constant dense<0.000000e+00> : vector<16x32xf32>
    %147 = tpu.matmul %146, %14, %cst_55 {dimension_numbers = #tpu.dot_dimension_numbers<[1], [0], [0], [1], [0, 0, 1, 1], [], []>} : vector<16x64xf32>, vector<64x32xf32>, vector<16x32xf32> -> vector<16x32xf32>
    %148 = vector.broadcast %20 : vector<1x32xf32> to vector<16x32xf32>
    %149 = arith.addf %147, %148 : vector<16x32xf32>
    %150 = arith.addf %141, %149 : vector<16x32xf32>
    %cst_56 = arith.constant dense<0.000000e+00> : vector<16xf32>
    %151 = vector.multi_reduction <add>, %150, %cst_56 [1] : vector<16x32xf32> to vector<16xf32>
    %152 = vector.shape_cast %151 : vector<16xf32> to vector<16x1xf32>
    %cst_57 = arith.constant 3.200000e+01 : f32
    %153 = vector.broadcast %cst_57 : f32 to vector<16x1xf32>
    %154 = arith.divf %152, %153 : vector<16x1xf32>
    %155 = vector.broadcast %154 : vector<16x1xf32> to vector<16x32xf32>
    %156 = arith.subf %150, %155 : vector<16x32xf32>
    %157 = arith.mulf %156, %156 : vector<16x32xf32>
    %cst_58 = arith.constant dense<0.000000e+00> : vector<16xf32>
    %158 = vector.multi_reduction <add>, %157, %cst_58 [1] : vector<16x32xf32> to vector<16xf32>
    %159 = vector.shape_cast %158 : vector<16xf32> to vector<16x1xf32>
    %cst_59 = arith.constant 3.200000e+01 : f32
    %160 = vector.broadcast %cst_59 : f32 to vector<16x1xf32>
    %161 = arith.divf %159, %160 : vector<16x1xf32>
    %162 = vector.broadcast %154 : vector<16x1xf32> to vector<16x32xf32>
    %163 = arith.subf %150, %162 : vector<16x32xf32>
    %cst_60 = arith.constant 9.99999974E-6 : f32
    %164 = vector.broadcast %cst_60 : f32 to vector<16x1xf32>
    %165 = arith.addf %161, %164 : vector<16x1xf32>
    %166 = math.rsqrt %165 : vector<16x1xf32>
    %167 = vector.broadcast %166 : vector<16x1xf32> to vector<16x32xf32>
    %168 = arith.mulf %163, %167 : vector<16x32xf32>
    %169 = vector.broadcast %23 : vector<1x32xf32> to vector<16x32xf32>
    %170 = arith.mulf %168, %169 : vector<16x32xf32>
    %171 = vector.broadcast %24 : vector<1x32xf32> to vector<16x32xf32>
    %172 = arith.addf %170, %171 : vector<16x32xf32>
    %c1_61 = arith.constant 1 : index
    %c0_62 = arith.constant 0 : index
    %c0_63 = arith.constant 0 : index
    %173 = vector.load %arg4[%c1_61, %c0_62, %c0_63] : memref<2x32x96xf32, #tpu.memory_space<vmem>>, vector<1x32x96xf32>
    %174 = vector.shape_cast %173 : vector<1x32x96xf32> to vector<32x96xf32>
    %c1_64 = arith.constant 1 : index
    %c0_65 = arith.constant 0 : index
    %c0_66 = arith.constant 0 : index
    %175 = vector.load %arg5[%c1_64, %c0_65, %c0_66] : memref<2x32x32xf32, #tpu.memory_space<vmem>>, vector<1x32x32xf32>
    %176 = vector.shape_cast %175 : vector<1x32x32xf32> to vector<32x32xf32>
    %c1_67 = arith.constant 1 : index
    %c0_68 = arith.constant 0 : index
    %c0_69 = arith.constant 0 : index
    %177 = vector.load %arg6[%c1_67, %c0_68, %c0_69] : memref<2x32x64xf32, #tpu.memory_space<vmem>>, vector<1x32x64xf32>
    %178 = vector.shape_cast %177 : vector<1x32x64xf32> to vector<32x64xf32>
    %c1_70 = arith.constant 1 : index
    %c0_71 = arith.constant 0 : index
    %c0_72 = arith.constant 0 : index
    %179 = vector.load %arg7[%c1_70, %c0_71, %c0_72] : memref<2x64x32xf32, #tpu.memory_space<vmem>>, vector<1x64x32xf32>
    %180 = vector.shape_cast %179 : vector<1x64x32xf32> to vector<64x32xf32>
    %c1_73 = arith.constant 1 : index
    %c0_74 = arith.constant 0 : index
    %c0_75 = arith.constant 0 : index
    %181 = vector.load %arg8[%c1_73, %c0_74, %c0_75] : memref<2x8x96xf32, #tpu.memory_space<vmem>>, vector<1x8x96xf32>
    %182 = vector.shape_cast %181 : vector<1x8x96xf32> to vector<8x96xf32>
    %183 = vector.extract_strided_slice %182 {offsets = [0, 0], sizes = [1, 96], strides = [1, 1]} : vector<8x96xf32> to vector<1x96xf32>
    %184 = vector.extract_strided_slice %182 {offsets = [1, 0], sizes = [1, 32], strides = [1, 1]} : vector<8x96xf32> to vector<1x32xf32>
    %185 = vector.extract_strided_slice %182 {offsets = [2, 0], sizes = [1, 64], strides = [1, 1]} : vector<8x96xf32> to vector<1x64xf32>
    %186 = vector.extract_strided_slice %182 {offsets = [3, 0], sizes = [1, 32], strides = [1, 1]} : vector<8x96xf32> to vector<1x32xf32>
    %187 = vector.extract_strided_slice %182 {offsets = [4, 0], sizes = [1, 32], strides = [1, 1]} : vector<8x96xf32> to vector<1x32xf32>
    %188 = vector.extract_strided_slice %182 {offsets = [5, 0], sizes = [1, 32], strides = [1, 1]} : vector<8x96xf32> to vector<1x32xf32>
    %189 = vector.extract_strided_slice %182 {offsets = [6, 0], sizes = [1, 32], strides = [1, 1]} : vector<8x96xf32> to vector<1x32xf32>
    %190 = vector.extract_strided_slice %182 {offsets = [7, 0], sizes = [1, 32], strides = [1, 1]} : vector<8x96xf32> to vector<1x32xf32>
    %cst_76 = arith.constant dense<0.000000e+00> : vector<16x96xf32>
    %191 = tpu.matmul %172, %174, %cst_76 {dimension_numbers = #tpu.dot_dimension_numbers<[1], [0], [0], [1], [0, 0, 1, 1], [], []>} : vector<16x32xf32>, vector<32x96xf32>, vector<16x96xf32> -> vector<16x96xf32>
    %192 = vector.broadcast %183 : vector<1x96xf32> to vector<16x96xf32>
    %193 = arith.addf %191, %192 : vector<16x96xf32>
    %194 = vector.extract_strided_slice %193 {offsets = [0, 0], sizes = [16, 32], strides = [1, 1]} : vector<16x96xf32> to vector<16x32xf32>
    %195 = vector.extract_strided_slice %193 {offsets = [0, 32], sizes = [16, 32], strides = [1, 1]} : vector<16x96xf32> to vector<16x32xf32>
    %196 = vector.extract_strided_slice %193 {offsets = [0, 64], sizes = [16, 32], strides = [1, 1]} : vector<16x96xf32> to vector<16x32xf32>
    %197 = arith.mulf %194, %2 : vector<16x32xf32>
    %cst_77 = arith.constant dense<0.000000e+00> : vector<16x32xf32>
    %198 = tpu.matmul %194, %6, %cst_77 {dimension_numbers = #tpu.dot_dimension_numbers<[1], [0], [0], [1], [0, 0, 1, 1], [], []>} : vector<16x32xf32>, vector<32x32xf32>, vector<16x32xf32> -> vector<16x32xf32>
    %199 = arith.mulf %198, %4 : vector<16x32xf32>
    %200 = arith.addf %197, %199 : vector<16x32xf32>
    %201 = arith.mulf %195, %2 : vector<16x32xf32>
    %cst_78 = arith.constant dense<0.000000e+00> : vector<16x32xf32>
    %202 = tpu.matmul %195, %6, %cst_78 {dimension_numbers = #tpu.dot_dimension_numbers<[1], [0], [0], [1], [0, 0, 1, 1], [], []>} : vector<16x32xf32>, vector<32x32xf32>, vector<16x32xf32> -> vector<16x32xf32>
    %203 = arith.mulf %202, %4 : vector<16x32xf32>
    %204 = arith.addf %201, %203 : vector<16x32xf32>
    %205 = vector.extract_strided_slice %200 {offsets = [0, 0], sizes = [16, 8], strides = [1, 1]} : vector<16x32xf32> to vector<16x8xf32>
    %206 = vector.extract_strided_slice %204 {offsets = [0, 0], sizes = [16, 8], strides = [1, 1]} : vector<16x32xf32> to vector<16x8xf32>
    %207 = tpu.transpose %206, [1, 0] : vector<16x8xf32> -> vector<8x16xf32>
    %cst_79 = arith.constant dense<0.000000e+00> : vector<16x16xf32>
    %208 = tpu.matmul %205, %207, %cst_79 {dimension_numbers = #tpu.dot_dimension_numbers<[1], [0], [0], [1], [0, 0, 1, 1], [], []>} : vector<16x8xf32>, vector<8x16xf32>, vector<16x16xf32> -> vector<16x16xf32>
    %cst_80 = arith.constant 0.353553385 : f32
    %209 = vector.broadcast %cst_80 : f32 to vector<16x16xf32>
    %210 = arith.mulf %208, %209 : vector<16x16xf32>
    %211 = arith.addf %210, %5 : vector<16x16xf32>
    %cst_81 = arith.constant dense<0xFF800000> : vector<16xf32>
    %212 = vector.multi_reduction <maximumf>, %211, %cst_81 [1] : vector<16x16xf32> to vector<16xf32>
    %213 = vector.shape_cast %212 : vector<16xf32> to vector<16x1xf32>
    %214 = vector.broadcast %213 : vector<16x1xf32> to vector<16x16xf32>
    %215 = arith.subf %211, %214 : vector<16x16xf32>
    %216 = math.exp %215 : vector<16x16xf32>
    %cst_82 = arith.constant dense<0.000000e+00> : vector<16xf32>
    %217 = vector.multi_reduction <add>, %216, %cst_82 [1] : vector<16x16xf32> to vector<16xf32>
    %218 = vector.shape_cast %217 : vector<16xf32> to vector<16x1xf32>
    %219 = tpu.reciprocal %218 {approx = true} : vector<16x1xf32> -> vector<16x1xf32>
    %220 = vector.broadcast %219 : vector<16x1xf32> to vector<16x16xf32>
    %221 = arith.mulf %216, %220 : vector<16x16xf32>
    %222 = vector.extract_strided_slice %196 {offsets = [0, 0], sizes = [16, 8], strides = [1, 1]} : vector<16x32xf32> to vector<16x8xf32>
    %cst_83 = arith.constant dense<0.000000e+00> : vector<16x8xf32>
    %223 = tpu.matmul %221, %222, %cst_83 {dimension_numbers = #tpu.dot_dimension_numbers<[1], [0], [0], [1], [0, 0, 1, 1], [], []>} : vector<16x16xf32>, vector<16x8xf32>, vector<16x8xf32> -> vector<16x8xf32>
    %224 = vector.extract_strided_slice %200 {offsets = [0, 8], sizes = [16, 8], strides = [1, 1]} : vector<16x32xf32> to vector<16x8xf32>
    %225 = vector.extract_strided_slice %204 {offsets = [0, 8], sizes = [16, 8], strides = [1, 1]} : vector<16x32xf32> to vector<16x8xf32>
    %226 = tpu.transpose %225, [1, 0] : vector<16x8xf32> -> vector<8x16xf32>
    %cst_84 = arith.constant dense<0.000000e+00> : vector<16x16xf32>
    %227 = tpu.matmul %224, %226, %cst_84 {dimension_numbers = #tpu.dot_dimension_numbers<[1], [0], [0], [1], [0, 0, 1, 1], [], []>} : vector<16x8xf32>, vector<8x16xf32>, vector<16x16xf32> -> vector<16x16xf32>
    %cst_85 = arith.constant 0.353553385 : f32
    %228 = vector.broadcast %cst_85 : f32 to vector<16x16xf32>
    %229 = arith.mulf %227, %228 : vector<16x16xf32>
    %230 = arith.addf %229, %5 : vector<16x16xf32>
    %cst_86 = arith.constant dense<0xFF800000> : vector<16xf32>
    %231 = vector.multi_reduction <maximumf>, %230, %cst_86 [1] : vector<16x16xf32> to vector<16xf32>
    %232 = vector.shape_cast %231 : vector<16xf32> to vector<16x1xf32>
    %233 = vector.broadcast %232 : vector<16x1xf32> to vector<16x16xf32>
    %234 = arith.subf %230, %233 : vector<16x16xf32>
    %235 = math.exp %234 : vector<16x16xf32>
    %cst_87 = arith.constant dense<0.000000e+00> : vector<16xf32>
    %236 = vector.multi_reduction <add>, %235, %cst_87 [1] : vector<16x16xf32> to vector<16xf32>
    %237 = vector.shape_cast %236 : vector<16xf32> to vector<16x1xf32>
    %238 = tpu.reciprocal %237 {approx = true} : vector<16x1xf32> -> vector<16x1xf32>
    %239 = vector.broadcast %238 : vector<16x1xf32> to vector<16x16xf32>
    %240 = arith.mulf %235, %239 : vector<16x16xf32>
    %241 = vector.extract_strided_slice %196 {offsets = [0, 8], sizes = [16, 8], strides = [1, 1]} : vector<16x32xf32> to vector<16x8xf32>
    %cst_88 = arith.constant dense<0.000000e+00> : vector<16x8xf32>
    %242 = tpu.matmul %240, %241, %cst_88 {dimension_numbers = #tpu.dot_dimension_numbers<[1], [0], [0], [1], [0, 0, 1, 1], [], []>} : vector<16x16xf32>, vector<16x8xf32>, vector<16x8xf32> -> vector<16x8xf32>
    %243 = vector.extract_strided_slice %200 {offsets = [0, 16], sizes = [16, 8], strides = [1, 1]} : vector<16x32xf32> to vector<16x8xf32>
    %244 = vector.extract_strided_slice %204 {offsets = [0, 16], sizes = [16, 8], strides = [1, 1]} : vector<16x32xf32> to vector<16x8xf32>
    %245 = tpu.transpose %244, [1, 0] : vector<16x8xf32> -> vector<8x16xf32>
    %cst_89 = arith.constant dense<0.000000e+00> : vector<16x16xf32>
    %246 = tpu.matmul %243, %245, %cst_89 {dimension_numbers = #tpu.dot_dimension_numbers<[1], [0], [0], [1], [0, 0, 1, 1], [], []>} : vector<16x8xf32>, vector<8x16xf32>, vector<16x16xf32> -> vector<16x16xf32>
    %cst_90 = arith.constant 0.353553385 : f32
    %247 = vector.broadcast %cst_90 : f32 to vector<16x16xf32>
    %248 = arith.mulf %246, %247 : vector<16x16xf32>
    %249 = arith.addf %248, %5 : vector<16x16xf32>
    %cst_91 = arith.constant dense<0xFF800000> : vector<16xf32>
    %250 = vector.multi_reduction <maximumf>, %249, %cst_91 [1] : vector<16x16xf32> to vector<16xf32>
    %251 = vector.shape_cast %250 : vector<16xf32> to vector<16x1xf32>
    %252 = vector.broadcast %251 : vector<16x1xf32> to vector<16x16xf32>
    %253 = arith.subf %249, %252 : vector<16x16xf32>
    %254 = math.exp %253 : vector<16x16xf32>
    %cst_92 = arith.constant dense<0.000000e+00> : vector<16xf32>
    %255 = vector.multi_reduction <add>, %254, %cst_92 [1] : vector<16x16xf32> to vector<16xf32>
    %256 = vector.shape_cast %255 : vector<16xf32> to vector<16x1xf32>
    %257 = tpu.reciprocal %256 {approx = true} : vector<16x1xf32> -> vector<16x1xf32>
    %258 = vector.broadcast %257 : vector<16x1xf32> to vector<16x16xf32>
    %259 = arith.mulf %254, %258 : vector<16x16xf32>
    %260 = vector.extract_strided_slice %196 {offsets = [0, 16], sizes = [16, 8], strides = [1, 1]} : vector<16x32xf32> to vector<16x8xf32>
    %cst_93 = arith.constant dense<0.000000e+00> : vector<16x8xf32>
    %261 = tpu.matmul %259, %260, %cst_93 {dimension_numbers = #tpu.dot_dimension_numbers<[1], [0], [0], [1], [0, 0, 1, 1], [], []>} : vector<16x16xf32>, vector<16x8xf32>, vector<16x8xf32> -> vector<16x8xf32>
    %262 = vector.extract_strided_slice %200 {offsets = [0, 24], sizes = [16, 8], strides = [1, 1]} : vector<16x32xf32> to vector<16x8xf32>
    %263 = vector.extract_strided_slice %204 {offsets = [0, 24], sizes = [16, 8], strides = [1, 1]} : vector<16x32xf32> to vector<16x8xf32>
    %264 = tpu.transpose %263, [1, 0] : vector<16x8xf32> -> vector<8x16xf32>
    %cst_94 = arith.constant dense<0.000000e+00> : vector<16x16xf32>
    %265 = tpu.matmul %262, %264, %cst_94 {dimension_numbers = #tpu.dot_dimension_numbers<[1], [0], [0], [1], [0, 0, 1, 1], [], []>} : vector<16x8xf32>, vector<8x16xf32>, vector<16x16xf32> -> vector<16x16xf32>
    %cst_95 = arith.constant 0.353553385 : f32
    %266 = vector.broadcast %cst_95 : f32 to vector<16x16xf32>
    %267 = arith.mulf %265, %266 : vector<16x16xf32>
    %268 = arith.addf %267, %5 : vector<16x16xf32>
    %cst_96 = arith.constant dense<0xFF800000> : vector<16xf32>
    %269 = vector.multi_reduction <maximumf>, %268, %cst_96 [1] : vector<16x16xf32> to vector<16xf32>
    %270 = vector.shape_cast %269 : vector<16xf32> to vector<16x1xf32>
    %271 = vector.broadcast %270 : vector<16x1xf32> to vector<16x16xf32>
    %272 = arith.subf %268, %271 : vector<16x16xf32>
    %273 = math.exp %272 : vector<16x16xf32>
    %cst_97 = arith.constant dense<0.000000e+00> : vector<16xf32>
    %274 = vector.multi_reduction <add>, %273, %cst_97 [1] : vector<16x16xf32> to vector<16xf32>
    %275 = vector.shape_cast %274 : vector<16xf32> to vector<16x1xf32>
    %276 = tpu.reciprocal %275 {approx = true} : vector<16x1xf32> -> vector<16x1xf32>
    %277 = vector.broadcast %276 : vector<16x1xf32> to vector<16x16xf32>
    %278 = arith.mulf %273, %277 : vector<16x16xf32>
    %279 = vector.extract_strided_slice %196 {offsets = [0, 24], sizes = [16, 8], strides = [1, 1]} : vector<16x32xf32> to vector<16x8xf32>
    %cst_98 = arith.constant dense<0.000000e+00> : vector<16x8xf32>
    %280 = tpu.matmul %278, %279, %cst_98 {dimension_numbers = #tpu.dot_dimension_numbers<[1], [0], [0], [1], [0, 0, 1, 1], [], []>} : vector<16x16xf32>, vector<16x8xf32>, vector<16x8xf32> -> vector<16x8xf32>
    %281 = tpu.concatenate %223, %242, %261, %280 in 1 : vector<16x8xf32>, vector<16x8xf32>, vector<16x8xf32>, vector<16x8xf32> -> vector<16x32xf32>
    %cst_99 = arith.constant dense<0.000000e+00> : vector<16x32xf32>
    %282 = tpu.matmul %281, %176, %cst_99 {dimension_numbers = #tpu.dot_dimension_numbers<[1], [0], [0], [1], [0, 0, 1, 1], [], []>} : vector<16x32xf32>, vector<32x32xf32>, vector<16x32xf32> -> vector<16x32xf32>
    %283 = vector.broadcast %184 : vector<1x32xf32> to vector<16x32xf32>
    %284 = arith.addf %282, %283 : vector<16x32xf32>
    %285 = arith.addf %172, %284 : vector<16x32xf32>
    %cst_100 = arith.constant dense<0.000000e+00> : vector<16xf32>
    %286 = vector.multi_reduction <add>, %285, %cst_100 [1] : vector<16x32xf32> to vector<16xf32>
    %287 = vector.shape_cast %286 : vector<16xf32> to vector<16x1xf32>
    %cst_101 = arith.constant 3.200000e+01 : f32
    %288 = vector.broadcast %cst_101 : f32 to vector<16x1xf32>
    %289 = arith.divf %287, %288 : vector<16x1xf32>
    %290 = vector.broadcast %289 : vector<16x1xf32> to vector<16x32xf32>
    %291 = arith.subf %285, %290 : vector<16x32xf32>
    %292 = arith.mulf %291, %291 : vector<16x32xf32>
    %cst_102 = arith.constant dense<0.000000e+00> : vector<16xf32>
    %293 = vector.multi_reduction <add>, %292, %cst_102 [1] : vector<16x32xf32> to vector<16xf32>
    %294 = vector.shape_cast %293 : vector<16xf32> to vector<16x1xf32>
    %cst_103 = arith.constant 3.200000e+01 : f32
    %295 = vector.broadcast %cst_103 : f32 to vector<16x1xf32>
    %296 = arith.divf %294, %295 : vector<16x1xf32>
    %297 = vector.broadcast %289 : vector<16x1xf32> to vector<16x32xf32>
    %298 = arith.subf %285, %297 : vector<16x32xf32>
    %cst_104 = arith.constant 9.99999974E-6 : f32
    %299 = vector.broadcast %cst_104 : f32 to vector<16x1xf32>
    %300 = arith.addf %296, %299 : vector<16x1xf32>
    %301 = math.rsqrt %300 : vector<16x1xf32>
    %302 = vector.broadcast %301 : vector<16x1xf32> to vector<16x32xf32>
    %303 = arith.mulf %298, %302 : vector<16x32xf32>
    %304 = vector.broadcast %187 : vector<1x32xf32> to vector<16x32xf32>
    %305 = arith.mulf %303, %304 : vector<16x32xf32>
    %306 = vector.broadcast %188 : vector<1x32xf32> to vector<16x32xf32>
    %307 = arith.addf %305, %306 : vector<16x32xf32>
    %cst_105 = arith.constant dense<0.000000e+00> : vector<16x64xf32>
    %308 = tpu.matmul %307, %178, %cst_105 {dimension_numbers = #tpu.dot_dimension_numbers<[1], [0], [0], [1], [0, 0, 1, 1], [], []>} : vector<16x32xf32>, vector<32x64xf32>, vector<16x64xf32> -> vector<16x64xf32>
    %309 = vector.broadcast %185 : vector<1x64xf32> to vector<16x64xf32>
    %310 = arith.addf %308, %309 : vector<16x64xf32>
    %cst_106 = arith.constant 0.000000e+00 : f32
    %311 = vector.broadcast %cst_106 : f32 to vector<16x64xf32>
    %312 = arith.maximumf %310, %311 : vector<16x64xf32>
    %cst_107 = arith.constant dense<0.000000e+00> : vector<16x32xf32>
    %313 = tpu.matmul %312, %180, %cst_107 {dimension_numbers = #tpu.dot_dimension_numbers<[1], [0], [0], [1], [0, 0, 1, 1], [], []>} : vector<16x64xf32>, vector<64x32xf32>, vector<16x32xf32> -> vector<16x32xf32>
    %314 = vector.broadcast %186 : vector<1x32xf32> to vector<16x32xf32>
    %315 = arith.addf %313, %314 : vector<16x32xf32>
    %316 = arith.addf %307, %315 : vector<16x32xf32>
    %cst_108 = arith.constant dense<0.000000e+00> : vector<16xf32>
    %317 = vector.multi_reduction <add>, %316, %cst_108 [1] : vector<16x32xf32> to vector<16xf32>
    %318 = vector.shape_cast %317 : vector<16xf32> to vector<16x1xf32>
    %cst_109 = arith.constant 3.200000e+01 : f32
    %319 = vector.broadcast %cst_109 : f32 to vector<16x1xf32>
    %320 = arith.divf %318, %319 : vector<16x1xf32>
    %321 = vector.broadcast %320 : vector<16x1xf32> to vector<16x32xf32>
    %322 = arith.subf %316, %321 : vector<16x32xf32>
    %323 = arith.mulf %322, %322 : vector<16x32xf32>
    %cst_110 = arith.constant dense<0.000000e+00> : vector<16xf32>
    %324 = vector.multi_reduction <add>, %323, %cst_110 [1] : vector<16x32xf32> to vector<16xf32>
    %325 = vector.shape_cast %324 : vector<16xf32> to vector<16x1xf32>
    %cst_111 = arith.constant 3.200000e+01 : f32
    %326 = vector.broadcast %cst_111 : f32 to vector<16x1xf32>
    %327 = arith.divf %325, %326 : vector<16x1xf32>
    %328 = vector.broadcast %320 : vector<16x1xf32> to vector<16x32xf32>
    %329 = arith.subf %316, %328 : vector<16x32xf32>
    %cst_112 = arith.constant 9.99999974E-6 : f32
    %330 = vector.broadcast %cst_112 : f32 to vector<16x1xf32>
    %331 = arith.addf %327, %330 : vector<16x1xf32>
    %332 = math.rsqrt %331 : vector<16x1xf32>
    %333 = vector.broadcast %332 : vector<16x1xf32> to vector<16x32xf32>
    %334 = arith.mulf %329, %333 : vector<16x32xf32>
    %335 = vector.broadcast %189 : vector<1x32xf32> to vector<16x32xf32>
    %336 = arith.mulf %334, %335 : vector<16x32xf32>
    %337 = vector.broadcast %190 : vector<1x32xf32> to vector<16x32xf32>
    %338 = arith.addf %336, %337 : vector<16x32xf32>
    %c0_113 = arith.constant 0 : index
    %c0_114 = arith.constant 0 : index
    %339 = vector.load %arg9[%c0_113, %c0_114] : memref<16x32xf32, #tpu.memory_space<vmem>>, vector<16x32xf32>
    tpu.vector_store %arg9[%c0_113, %c0_114], %338 {strides = array<i32>} : memref<16x32xf32, #tpu.memory_space<vmem>>, vector<16x32xf32>,
    return
  }
}

</mosaic_0001>

<bundles_post_ra>
// kernel: tile.13
= control target key start
LH: loop header
LB: loop body
LE: loop exit
PB: predicated region body
PF: predicated region fallthrough
CT: control target
= control target key end

     0   :  { %s154_s0 = inlined_call_operand.vmem [shape: f32[8,8], index: 0, kind: input, shape index: {}]   ;;  %s155_s1 = inlined_call_operand.vmem [shape: f32[2,8,4,8], index: 1, kind: output, shape index: {}]  }
   0x1   :  { %v4_v0 = vld [vmem:[%s154_s0] ss:$0 sm:$0xff]  ;;  %v51_v1 = vld [vmem:[%s154_s0 + $0x1] ss:$0 sm:$0xff]  ;;  %v54_v2 = vld [vmem:[%s154_s0 + $0x2] ss:$0 sm:$0xff] }
   0x2   :  { %5 = vst [vmem:[%s155_s1] sm:$0xf] %v4_v0  ;;  %50 = vst [vmem:[%s155_s1 + $0x20] sm:$0xf] %v4_v0  ;;  %v57_v3 = vld [vmem:[%s154_s0 + $0x3] ss:$0 sm:$0xff] }
   0x3   :  { %52 = vst [vmem:[%s155_s1 + $0x4] sm:$0xf] %v51_v1  ;;  %53 = vst [vmem:[%s155_s1 + $0x24] sm:$0xf] %v51_v1  ;;  %v60_v4 = vld [vmem:[%s154_s0 + $0x4] ss:$0 sm:$0xff] }
   0x4   :  { %55 = vst [vmem:[%s155_s1 + $0x8] sm:$0xf] %v54_v2  ;;  %56 = vst [vmem:[%s155_s1 + $0x28] sm:$0xf] %v54_v2  ;;  %v63_v5 = vld [vmem:[%s154_s0 + $0x5] ss:$0 sm:$0xff] }
   0x5   :  { %58 = vst [vmem:[%s155_s1 + $0xc] sm:$0xf] %v57_v3  ;;  %59 = vst [vmem:[%s155_s1 + $0x2c] sm:$0xf] %v57_v3  ;;  %v66_v6 = vld [vmem:[%s154_s0 + $0x6] ss:$0 sm:$0xff] }
   0x6   :  { %61 = vst [vmem:[%s155_s1 + $0x10] sm:$0xf] %v60_v4  ;;  %62 = vst [vmem:[%s155_s1 + $0x30] sm:$0xf] %v60_v4  ;;  %v69_v7 = vld [vmem:[%s154_s0 + $0x7] ss:$0 sm:$0xff] }
   0x7   :  { %64 = vst [vmem:[%s155_s1 + $0x14] sm:$0xf] %v63_v5  ;;  %65 = vst [vmem:[%s155_s1 + $0x34] sm:$0xf] %v63_v5 }
   0x8   :  { %67 = vst [vmem:[%s155_s1 + $0x18] sm:$0xf] %v66_v6  ;;  %68 = vst [vmem:[%s155_s1 + $0x38] sm:$0xf] %v66_v6 }
   0x9   :  { %70 = vst [vmem:[%s155_s1 + $0x1c] sm:$0xf] %v69_v7  ;;  %71 = vst [vmem:[%s155_s1 + $0x3c] sm:$0xf] %v69_v7 }

// kernel: tile.18
= control target key start
LH: loop header
LB: loop body
LE: loop exit
PB: predicated region body
PF: predicated region fallthrough
CT: control target
= control target key end

     0   :  { %vm83_vm0 = vcmask 1047556   ;;  %vm85_vm1 = vcmask 64512   ;;  %s196_s9 = smov 24   ;;  %s197_s14 = smov 8   ;;  %vm104_vm2 = vcmask 261312   ;;  %vm125_vm3 = vcmask 195712   ;;  %s290_s0 = inlined_call_operand.vmem [shape: f32[2,8,4,8], index: 0, kind: input, shape index: {}]   ;;  %s291_s1 = inlined_call_operand.vmem [shape: f32[1,16,32], index: 1, kind: output, shape index: {}]  }
   0x1   :  { %v181_v0 = vld [vmem:[%s290_s0 + $0x1c] sm:$0xf]  ;;  %v182_v1 = vld [vmem:[%s290_s0 + $0x18] sm:$0xf]  ;;  %v183_v2 = vld [vmem:[%s290_s0 + $0x14] sm:$0xf] }
   0x2   :  { %49 = vst [vmem:[#allocation0 + $0x38] sm:$0xf] %v181_v0  ;;  %54 = vst [vmem:[#allocation0 + $0x30] sm:$0xf] %v182_v1  ;;  %v184_v3 = vld [vmem:[%s290_s0 + $0x10] sm:$0xf] }
   0x3   :  { %59 = vst [vmem:[#allocation0 + $0x28] sm:$0xf] %v183_v2  ;;  %v185_v4 = vld [vmem:[%s290_s0 + $0xc] sm:$0xf]  ;;  %v186_v5 = vld [vmem:[%s290_s0 + $0x8] sm:$0xf] }
   0x4   :  { %64 = vst [vmem:[#allocation0 + $0x20] sm:$0xf] %v184_v3  ;;  %69 = vst [vmem:[#allocation0 + $0x18] sm:$0xf] %v185_v4  ;;  %v187_v6 = vld [vmem:[%s290_s0 + $0x4] sm:$0xf] }
   0x5   :  { %74 = vst [vmem:[#allocation0 + $0x10] sm:$0xf] %v186_v5  ;;  %v79_v7 = vld [vmem:[%s290_s0] sm:$0xf]  ;;  %78 = vst [vmem:[#allocation0 + $0x8] sm:$0xf] %v187_v6 }
   0x6   :  { %80 = vst [vmem:[#allocation0] sm:$0xf] %v79_v7  ;;  %v173_v8 = vld [vmem:[%s290_s0 + $0x3c] sm:$0xf]  ;;  %v174_v9 = vld [vmem:[%s290_s0 + $0x38] sm:$0xf] }
   0x7   :  { %9 = vst [vmem:[#allocation0 + $0x78] sm:$0xf] %v173_v8  ;;  %14 = vst [vmem:[#allocation0 + $0x70] sm:$0xf] %v174_v9  ;;  %v175_v10 = vld [vmem:[%s290_s0 + $0x34] sm:$0xf] }
   0x8   :  { %v176_v11 = vld [vmem:[%s290_s0 + $0x30] sm:$0xf]  ;;  %v177_v12 = vld [vmem:[%s290_s0 + $0x2c] sm:$0xf]  ;;  %19 = vst [vmem:[#allocation0 + $0x68] sm:$0xf] %v175_v10 }
   0x9   :  { %24 = vst [vmem:[#allocation0 + $0x60] sm:$0xf] %v176_v11  ;;  %29 = vst [vmem:[#allocation0 + $0x58] sm:$0xf] %v177_v12  ;;  %v178_v13 = vld [vmem:[%s290_s0 + $0x28] sm:$0xf] }
   0xa   :  { %v179_v14 = vld [vmem:[%s290_s0 + $0x24] sm:$0xf]  ;;  %v180_v15 = vld [vmem:[%s290_s0 + $0x20] sm:$0xf]  ;;  %34 = vst [vmem:[#allocation0 + $0x50] sm:$0xf] %v178_v13 }
   0xb   :  { %39 = vst [vmem:[#allocation0 + $0x48] sm:$0xf] %v179_v14  ;;  %44 = vst [vmem:[#allocation0 + $0x40] sm:$0xf] %v180_v15  ;;  %s195_s0 = smov 16   ;;  %vm146_vm4 = vcmask 130112  }
   0xc   :  { %v120_v16 = vld [vmem:[#allocation0 + $0x2] ss:$8 sm:$0xf0]   ;;  %v99_v17 = vld [vmem:[#allocation0 + $0x3] ss:$8 sm:$0xf0]  }
   0xd   :  { %v118_v18 = vld [vmem:[#allocation0 + $0x2] ss:$8 sm:$0xf]   ;;  %v97_v19 = vld [vmem:[#allocation0 + $0x3] ss:$8 sm:$0xf]  }
   0xe   :  { %v122_v20 = vsel %vm83_vm0, %v120_v16, %v118_v18  ;;  %v101_v21 = vsel %vm83_vm0, %v99_v17, %v97_v19  ;;  %v139_v24 = vld [vmem:[#allocation0 + $0x1] ss:$8 sm:$0xf]   ;;  %v81_v32 = vld [vmem:[#allocation0] ss:$8 sm:$0xf]  }
   0xf   :  { %123 = vrot.lane.b32.xlu1 %v122_v20, %s195_s0  ;;  %102 = vrot.lane.b32.xlu0 %v101_v21, %s196_s9  ;;  %v141_v25 = vld [vmem:[#allocation0 + $0x1] ss:$8 sm:$0xf0]   ;;  %v82_v33 = vld [vmem:[#allocation0] ss:$8 sm:$0xf0]  }
  0x10   :  { %v130_v22 = vld [vmem:[#allocation0 + $0x42] ss:$8 sm:$0xf0]   ;;  %v109_v23 = vld [vmem:[#allocation0 + $0x43] ss:$8 sm:$0xf0]   ;;  %v84_v34 = vsel %vm83_vm0, %v82_v33, %v81_v32  ;;  %v143_v38 = vsel %vm83_vm0, %v141_v25, %v139_v24 }
  0x11   :  { %v151_v31 = vld [vmem:[#allocation0 + $0x41] ss:$8 sm:$0xf0]   ;;  %v90_v36 = vld [vmem:[#allocation0 + $0x40] ss:$8 sm:$0xf0]  }
  0x12   :  { %v128_v26 = vld [vmem:[#allocation0 + $0x42] ss:$8 sm:$0xf]   ;;  %v107_v27 = vld [vmem:[#allocation0 + $0x43] ss:$8 sm:$0xf]  }
  0x13   :  { %v132_v28 = vsel %vm83_vm0, %v130_v22, %v128_v26  ;;  %v111_v29 = vsel %vm83_vm0, %v109_v23, %v107_v27  ;;  %v149_v30 = vld [vmem:[#allocation0 + $0x41] ss:$8 sm:$0xf]   ;;  %v88_v35 = vld [vmem:[#allocation0 + $0x40] ss:$8 sm:$0xf]  }
  0x14   :  { %133 = vrot.lane.b32.xlu1 %v132_v28, %s195_s0  ;;  %112 = vrot.lane.b32.xlu0 %v111_v29, %s196_s9  ;;  %v153_v37 = vsel %vm83_vm0, %v151_v31, %v149_v30  ;;  %86 = vst.msk [vmem:[%s291_s1] sm:$0xff] %vm85_vm1, %v84_v34   ;;  %v92_v39 = vsel %vm83_vm0, %v90_v36, %v88_v35 }
  0x15   :  { %188 = vst.msk [vmem:[%s291_s1 + $0x8] sm:$0xff] %vm85_vm1, %v92_v39  }
  0x18   :  { %154 = vrot.lane.b32.xlu1 %v153_v37, %s197_s14  ;;  %144 = vrot.lane.b32.xlu0 %v143_v38, %s197_s14 }
  0x81   :  { %v124_v40 = vpop.permute.xlu1 %123   ;;  %v103_v41 = vpop.permute.xlu0 %102  }
  0x82   :  { %105 = vst.msk [vmem:[%s291_s1] sm:$0xff] %vm104_vm2, %v103_v41  }
  0x83   :  { %126 = vst.msk [vmem:[%s291_s1] sm:$0xff] %vm125_vm3, %v124_v40  }
  0x86   :  { %v134_v42 = vpop.permute.xlu1 %133   ;;  %v113_v43 = vpop.permute.xlu0 %112  }
  0x87   :  { %189 = vst.msk [vmem:[%s291_s1 + $0x8] sm:$0xff] %vm104_vm2, %v113_v43  }
  0x88   :  { %190 = vst.msk [vmem:[%s291_s1 + $0x8] sm:$0xff] %vm125_vm3, %v134_v42  }
  0x8a   :  { %v155_v44 = vpop.permute.xlu1 %154   ;;  %v145_v45 = vpop.permute.xlu0 %144  }
  0x8b   :  { %191 = vst.msk [vmem:[%s291_s1 + $0x8] sm:$0xff] %vm146_vm4, %v155_v44   ;;  %147 = vst.msk [vmem:[%s291_s1] sm:$0xff] %vm146_vm4, %v145_v45  }

// kernel: roformer_decoder.1
= control target key start
LH: loop header
LB: loop body
LE: loop exit
PB: predicated region body
PF: predicated region fallthrough
CT: control target
= control target key end

     0   :  { %vm71_vm0 = vcmask 261120   ;;  %s3650_s19 = smov 32   ;;  %s4383_s0 = inlined_call_operand.vmem [shape: f32[16,32], index: 0, kind: input, shape index: {}]   ;;  %s4384_s1 = inlined_call_operand.vmem [shape: f32[2,16,32], index: 1, kind: input, shape index: {}]   ;;  %s4385_s2 = inlined_call_operand.vmem [shape: f32[16,16], index: 2, kind: input, shape index: {}]   ;;  %s4386_s3 = inlined_call_operand.vmem [shape: f32[32,32], index: 3, kind: input, shape index: {}]   ;;  %s4387_s4 = inlined_call_operand.vmem [shape: f32[2,32,96], index: 4, kind: input, shape index: {}]   ;;  %s4388_s5 = inlined_call_operand.vmem [shape: f32[2,32,32], index: 5, kind: input, shape index: {}]   ;;  %s4389_s6 = inlined_call_operand.vmem [shape: f32[2,32,64], index: 6, kind: input, shape index: {}]   ;;  %s4390_s7 = inlined_call_operand.vmem [shape: f32[2,64,32], index: 7, kind: input, shape index: {}]   ;;  %s4391_s8 = inlined_call_operand.vmem [shape: f32[2,8,96], index: 8, kind: input, shape index: {}]   ;;  %s4392_s9 = inlined_call_operand.hbm [shape: f32[16,32], index: 9, kind: output, shape index: {}]  }
   0x1   :  { %v49_v0 = vld [vmem:[%s4387_s4 + $0x18] sm:$0xff]  ;;  %v48_v1 = vld [vmem:[%s4387_s4 + $0x10] sm:$0xff]  ;;  %v3726_v2 = vld [vmem:[%s4383_s0] sm:$0xff] }
   0x2   :  { %3268 = vmatprep.subr.mxu1 %v49_v0  ;;  %v47_v3 = vld [vmem:[%s4387_s4 + $0x8] sm:$0xff]  ;;  %3276 = vmatprep.mubr.msk.f32.mxu1 %vm71_vm0, %v3726_v2  ;;  %v3743_v5 = vld [vmem:[%s4386_s3 + $0x18] sm:$0xff] }
   0x3   :  { %3269 = vmatpush3.msra.mxu1 %v49_v0  ;;  %v3736_v4 = vld [vmem:[%s4384_s1 + $0x8] sm:$0xff] }
   0x4   :  { %3270 = vmatprep.subr.mxu1 %v48_v1  ;;  %244 = vrot.lane.b32.xlu1 %v3736_v4, %s3650_s19 }
   0x5   :  { %14 = vsyncpa [#allocation3], 0  ;;  %3271 = vmatpush3.msra.mxu1 %v48_v1  ;;  %v46_v6 = vld [vmem:[%s4387_s4] sm:$0xff]  ;;  %3290 = vmatprep.subr.mxu0 %v3743_v5  ;;  %v3753_v7 = vld [vmem:[%s4383_s0 + $0x8] sm:$0xff]  ;;  %v67_v11 = vlaneseq  ;;  %vm351_vm1 = vcmask 64512   ;;  %s3652_s18 = smov 88  }
   0x6   :  { %3272 = vmatprep.subr.mxu1 %v47_v3  ;;  %3291 = vmatpush3.msra.mxu0 %v3743_v5  ;;  %v3762_v8 = vld [vmem:[%s4386_s3 + $0x10] sm:$0xff]  ;;  %v3770_v9 = vld [vmem:[%s4386_s3 + $0x8] sm:$0xff]  ;;  %v3779_v10 = vld [vmem:[%s4386_s3] sm:$0xff]  ;;  %s3651_s3 = smov 96   ;;  %s3653_s20 = smov 120   ;;  %vm441_vm2 = vcmask 130048  }
   0x7   :  { %3273 = vmatpush3.msra.mxu1 %v47_v3  ;;  %3292 = vmatprep.subr.mxu0 %v3762_v8  ;;  %v3786_v12 = vshrl.u32 %v67_v11, 7  ;;  %v3792_v14 = vld [vmem:[%s4391_s8] sm:$0xff]  ;;  %v3821_v24 = vld [vmem:[%s4384_s1 + $0x10] sm:$0xff]  ;;  %v3833_v29 = vld [vmem:[%s4384_s1 + $0x18] sm:$0xff]  ;;  %s3654_s25 = smov 64   ;;  %s3655_s26 = smov 56  }
   0x8   :  { %3274 = vmatprep.subr.mxu1 %v46_v6  ;;  %3293 = vmatpush3.msra.mxu0 %v3762_v8  ;;  %v3812_v20 = vld [vmem:[%s4384_s1] sm:$0xff]  ;;  %v3883_v52 = vld [vmem:[%s4385_s2 + $0x8] sm:$0xff]  ;;  %s3656_s27 = smov 80   ;;  %s3657_s0 = smov 112   ;;  %vm1191_vm3 = vcmask 195584   ;;  %vm1411_vm4 = vcmask 523264  }
   0x9   :  { %3275 = vmatpush3.msra.mxu1 %v46_v6  ;;  %3294 = vmatprep.subr.mxu0 %v3770_v9  ;;  %v69_v13 = vsub.s32 0, %v3786_v12  ;;  %v3888_v55 = vld [vmem:[%s4385_s2] sm:$0xff]  ;;  %s3658_s28 = smov 48   ;;  %s3659_s29 = smov 72  }
   0xa   :  { %3277 = vmatmul.mubr.msk.f32.vlgmr.msra.gmra.mxu1 %vm71_vm0, %v3753_v7  ;;  %3279 = vmatprep.subr.mxu1 %v3743_v5  ;;  %s3660_s30 = smov 104   ;;  %s3661_s10 = smov 40  }
   0xb   :  { %3280 = vmatpush3.msra.mxu1 %v3743_v5  ;;  %3295 = vmatpush3.msra.mxu0 %v3770_v9  ;;  %v70_v15 = vrot.slane %v3792_v14, %v69_v13  ;;  %s3662_s11 = smov 8   ;;  %s3663_s12 = smov 16  }
   0xc   :  { %3281 = vmatprep.subr.mxu1 %v3762_v8  ;;  %3296 = vmatprep.subr.mxu0 %v3779_v10  ;;  %s3664_s24 = smov 24  }
   0xd   :  { %3282 = vmatpush3.msra.mxu1 %v3762_v8  ;;  %3297 = vmatpush3.msra.mxu0 %v3779_v10 }
   0xe   :  { %3283 = vmatprep.subr.mxu1 %v3770_v9 }
   0xf   :  { %3284 = vmatpush3.msra.mxu1 %v3770_v9 }
  0x10   :  { %3285 = vmatprep.subr.mxu1 %v3779_v10 }
  0x11   :  { %3286 = vmatpush3.msra.mxu1 %v3779_v10 }
  0x76   :  { %v3839_v34 = vpop.permute.xlu1 %244 }
  0xca   :  { %v3278_v16 = vpop.f32.mrf.mxu1 }
  0xcb   :  { %v3799_v19 = vadd.f32 %v3278_v16, %v70_v15 }
  0xcc   :  { %v144_v17 = vpop.f32.mrf.mxu1 }
  0xcd   :  { %v3797_v18 = vadd.f32 %v144_v17, %v70_v15  ;;  %v249_v35 = vmul.f32 %v3839_v34, %v3799_v19  ;;  %v154_v43 = vmul.f32 %v3799_v19, %v3736_v4 }
  0xcf   :  { %250 = vrot.lane.b32.xlu0 %v3797_v18, %s3651_s3  ;;  %3287 = vmatprep.mubr.msk.f32.mxu1 %vm71_vm0, %v3797_v18  ;;  %v153_v26 = vmul.f32 %v3797_v18, %v3812_v20 }
  0xd0   :  { %3288 = vmatmul.mubr.msk.f32.vlgmr.msra.gmra.mxu1 %vm71_vm0, %v3799_v19 }
  0xd3   :  { %252 = vrot.lane.b32.xlu0 %v3799_v19, %s3651_s3 }
  0xd7   :  { %242 = vrot.lane.b32.xlu0 %v3812_v20, %s3650_s19 }
 0x141   :  { %v251_v21 = vpop.permute.xlu0 %250 }
 0x142   :  { %3298 = vmatprep.mubr.msk.f32.mxu0 %vm71_vm0, %v251_v21 }
 0x145   :  { %v253_v22 = vpop.permute.xlu0 %252 }
 0x146   :  { %3299 = vmatmul.mubr.msk.f32.vlgmr.msra.gmra.mxu0 %vm71_vm0, %v253_v22 }
 0x149   :  { %v3843_v36 = vpop.permute.xlu0 %242 }
 0x14a   :  { %v248_v39 = vmul.f32 %v3843_v36, %v3797_v18 }
 0x190   :  { %v3289_v23 = vpop.f32.mrf.mxu1 }
 0x191   :  { %v237_v42 = vmul.f32 %v3289_v23, %v3833_v29 }
 0x192   :  { %v227_v25 = vpop.f32.mrf.mxu1 }
 0x193   :  { %v236_v27 = vmul.f32 %v3821_v24, %v227_v25  ;;  %v3864_v44 = vadd.f32 %v237_v42, %v154_v43 }
 0x195   :  { %v3826_v28 = vadd.f32 %v236_v27, %v153_v26 }
 0x197   :  { %3305 = vmatprep.mubr.msk.f32.mxu1 %vm351_vm1, %v3826_v28 }
 0x206   :  { %v3300_v30 = vpop.f32.mrf.mxu0 }
 0x207   :  { %v334_v31 = vmul.f32 %v3300_v30, %v3833_v29 }
 0x208   :  { %v324_v32 = vpop.f32.mrf.mxu0 }
 0x209   :  { %339 = vrot.lane.b32.xlu1 %v334_v31, %s3650_s19  ;;  %v333_v33 = vmul.f32 %v3821_v24, %v324_v32 }
 0x20d   :  { %337 = vrot.lane.b32.xlu1 %v333_v33, %s3650_s19 }
 0x27b   :  { %v340_v37 = vpop.permute.xlu1 %339 }
 0x27c   :  { %v3845_v38 = vadd.f32 %v340_v37, %v249_v35 }
 0x27e   :  { %349 = vrot.lane.b32.xlu0 %v3845_v38, %s3651_s3 }
 0x27f   :  { %v338_v40 = vpop.permute.xlu1 %337 }
 0x280   :  { %v3851_v41 = vadd.f32 %v338_v40, %v248_v39 }
 0x282   :  { %557 = vrot.lane.b32.xlu0 %v3845_v38, %s3652_s18  ;;  %347 = vrot.lane.b32.xlu1 %v3851_v41, %s3651_s3 }
 0x286   :  { %555 = vrot.lane.b32.xlu1 %v3851_v41, %s3652_s18  ;;  %551 = vrot.lane.b32.xlu0 %v3826_v28, %s3653_s20 }
 0x28a   :  { %553 = vrot.lane.b32.xlu1 %v3864_v44, %s3653_s20 }
 0x2f0   :  { %v350_v45 = vpop.permute.xlu0 %349 }
 0x2f1   :  { %3301 = vmatprep.subr.msk.mxu1 %vm351_vm1, %v350_v45 }
 0x2f2   :  { %3302 = vmatpush3.xpose.msk.msra.mxu1 %vm351_vm1, %v350_v45 }
 0x2f4   :  { %v348_v46 = vpop.permute.xlu1 %347  ;;  %v558_v47 = vpop.permute.xlu0 %557 }
 0x2f5   :  { %3303 = vmatprep.subr.msk.mxu1 %vm351_vm1, %v348_v46 }
 0x2f6   :  { %3304 = vmatpush3.xpose.msk.msra.mxu1 %vm351_vm1, %v348_v46 }
 0x2f7   :  { %3315 = vmatprep.subr.msk.mxu1 %vm351_vm1, %v558_v47 }
 0x2f8   :  { %v552_v48 = vpop.permute.xlu0 %551  ;;  %v556_v49 = vpop.permute.xlu1 %555 }
 0x2f9   :  { %3306 = vmatmul.mubr.msk.f32.vlgmr.msra.gmra.mxu1 %vm351_vm1, %v3864_v44 }
 0x2fa   :  { %3316 = vmatpush3.xpose.msk.msra.mxu1 %vm351_vm1, %v558_v47  ;;  %3319 = vmatprep.mubr.msk.f32.mxu1 %vm351_vm1, %v552_v48 }
 0x2fb   :  { %3317 = vmatprep.subr.msk.mxu1 %vm351_vm1, %v556_v49 }
 0x2fc   :  { %v554_v50 = vpop.permute.xlu1 %553 }
 0x2fe   :  { %3318 = vmatpush3.xpose.msk.msra.mxu1 %vm351_vm1, %v556_v49 }
 0x301   :  { %3320 = vmatmul.mubr.msk.f32.vlgmr.msra.gmra.mxu1 %vm351_vm1, %v554_v50 }
 0x3b9   :  { %v3307_v51 = vpop.f32.mrf.mxu1 }
 0x3ba   :  { %v438_v53 = vmul.f32 0.35355338, %v3307_v51 }
 0x3bb   :  { %v428_v54 = vpop.f32.mrf.mxu1 }
 0x3bc   :  { %v437_v56 = vmul.f32 0.35355338, %v428_v54  ;;  %v440_v57 = vadd.f32 %v438_v53, %v3883_v52 }
 0x3be   :  { %v445_v58 = vsel %vm441_vm2, %v440_v57, -inf  ;;  %v439_v59 = vadd.f32 %v437_v56, %v3888_v55 }
 0x3bf   :  { %446 = vmax.xlane.f32.xlu1 %v445_v58 }
 0x3c0   :  { %v442_v60 = vsel %vm441_vm2, %v439_v59, -inf }
 0x3c1   :  { %v3321_v61 = vpop.f32.mrf.mxu1  ;;  %443 = vmax.xlane.f32.xlu0 %v442_v60 }
 0x3c2   :  { %v643_v63 = vmul.f32 0.35355338, %v3321_v61 }
 0x3c3   :  { %v633_v62 = vpop.f32.mrf.mxu1 }
 0x3c4   :  { %v642_v0 = vmul.f32 0.35355338, %v633_v62  ;;  %v645_v4 = vadd.f32 %v643_v63, %v3883_v52 }
 0x3c6   :  { %v644_v1 = vadd.f32 %v642_v0, %v3888_v55  ;;  %v649_v6 = vsel %vm441_vm2, %v645_v4, -inf }
 0x3c8   :  { %v646_v3 = vsel %vm441_vm2, %v644_v1, -inf }
 0x3c9   :  { %647 = vmax.xlane.f32.xlu0 %v646_v3 }
 0x3cd   :  { %650 = vmax.xlane.f32.xlu0 %v649_v6 }
 0x3d0   :  { %466 = vrot.lane.b32.xlu1 %v3799_v19, %s3654_s25 }
 0x3d4   :  { %670 = vrot.lane.b32.xlu1 %v3799_v19, %s3655_s26 }
 0x3d8   :  { %668 = vrot.lane.b32.xlu1 %v3797_v18, %s3655_s26 }
 0x3e3   :  { %464 = vrot.lane.b32.xlu0 %v3797_v18, %s3654_s25 }
 0x448   :  { %v447_v11 = vpop.xlane.xlu1 %446 }
 0x449   :  { %v449_v15 = vsub.f32 %v440_v57, %v447_v11 }
 0x44a   :  { %v444_v16 = vpop.xlane.xlu0 %443 }
 0x44b   :  { %v452_v17 = vmul.f32 1.442695, %v449_v15  ;;  %v448_v21 = vsub.f32 %v439_v59, %v444_v16 }
 0x44c   :  { %v467_v22 = vpop.permute.xlu1 %466 }
 0x44d   :  { %3545 = vpow2.f32 %v452_v17  ;;  %v450_v23 = vmul.f32 1.442695, %v448_v21  ;;  %3308 = vmatprep.subr.mxu0 %v467_v22 }
 0x44e   :  { %3309 = vmatpush3.msra.mxu0 %v467_v22 }
 0x44f   :  { %3547 = vpow2.f32 %v450_v23 }
 0x450   :  { %v671_v37 = vpop.permute.xlu1 %670 }
 0x452   :  { %v648_v25 = vpop.xlane.xlu0 %647 }
 0x453   :  { %v652_v43 = vsub.f32 %v644_v1, %v648_v25 }
 0x454   :  { %v669_v48 = vpop.permute.xlu1 %668 }
 0x455   :  { %v654_v45 = vmul.f32 1.442695, %v652_v43 }
 0x456   :  { %v651_v26 = vpop.xlane.xlu0 %650 }
 0x457   :  { %v653_v27 = vsub.f32 %v645_v4, %v651_v26 }
 0x459   :  { %v656_v30 = vmul.f32 1.442695, %v653_v27 }
 0x45a   :  { %v3546_v31 = vpop.eup %3545  ;;  %v465_v32 = vpop.permute.xlu0 %464 }
 0x45b   :  { %3549 = vpow2.f32 %v656_v30  ;;  %3310 = vmatprep.subr.mxu0 %v465_v32  ;;  %v457_v33 = vsel %vm441_vm2, %v3546_v31, 0.0 }
 0x45c   :  { %v3548_v35 = vpop.eup %3547  ;;  %458 = vadd.xlane.f32.xlu0 %v457_v33  ;;  %3311 = vmatpush3.msra.mxu0 %v465_v32  ;;  %3551 = vpow2.f32 %v654_v45 }
 0x45d   :  { %3322 = vmatprep.subr.mxu0 %v671_v37  ;;  %v454_v39 = vsel %vm441_vm2, %v3548_v35, 0.0 }
 0x45e   :  { %455 = vadd.xlane.f32.xlu1 %v454_v39 }
 0x468   :  { %v3550_v40 = vpop.eup %3549 }
 0x469   :  { %v661_v42 = vsel %vm441_vm2, %v3550_v40, 0.0  ;;  %v3552_v46 = vpop.eup %3551 }
 0x46a   :  { %662 = vadd.xlane.f32.xlu0 %v661_v42  ;;  %v658_v47 = vsel %vm441_vm2, %v3552_v46, 0.0 }
 0x46f   :  { %759 = vrot.lane.b32.xlu1 %v3851_v41, %s3656_s27 }
 0x480   :  { %761 = vrot.lane.b32.xlu0 %v3845_v38, %s3656_s27 }
 0x484   :  { %755 = vrot.lane.b32.xlu0 %v3826_v28, %s3657_s0 }
 0x493   :  { %659 = vadd.xlane.f32.xlu1 %v658_v47 }
 0x4a4   :  { %757 = vrot.lane.b32.xlu1 %v3864_v44, %s3657_s0 }
 0x4e5   :  { %v459_v49 = vpop.xlane.xlu0 %458 }
 0x4e6   :  { %3553 = vrcp.f32 %v459_v49 }
 0x4e7   :  { %v456_v50 = vpop.xlane.xlu1 %455 }
 0x4e8   :  { %3555 = vrcp.f32 %v456_v50 }
 0x4eb   :  { %v760_v59 = vpop.permute.xlu1 %759 }
 0x4f3   :  { %v3554_v51 = vpop.eup %3553  ;;  %v663_v54 = vpop.xlane.xlu0 %662 }
 0x4f4   :  { %v463_v57 = vmul.f32 %v3554_v51, %v3546_v31  ;;  %3557 = vrcp.f32 %v663_v54 }
 0x4f5   :  { %v3556_v53 = vpop.eup %3555 }
 0x4f6   :  { %v462_v56 = vmul.f32 %v3556_v53, %v3548_v35 }
 0x4f7   :  { %v762_v58 = vpop.permute.xlu0 %761 }
 0x4f8   :  { %3312 = vmatprep.mubr.msk.f32.mxu0 %vm441_vm2, %v462_v56 }
 0x4f9   :  { %3313 = vmatmul.mubr.msk.f32.vlgmr.msra.gmra.mxu0 %vm441_vm2, %v463_v57 }
 0x4fa   :  { %3323 = vmatpush3.msra.mxu0 %v671_v37 }
 0x4fb   :  { %3324 = vmatprep.subr.mxu0 %v669_v48  ;;  %v756_v1 = vpop.permute.xlu0 %755 }
 0x4fc   :  { %3325 = vmatpush3.msra.mxu0 %v669_v48 }
 0x4fd   :  { %3329 = vmatprep.subr.msk.mxu0 %vm351_vm1, %v762_v58 }
 0x501   :  { %v3558_v61 = vpop.eup %3557 }
 0x502   :  { %v667_v0 = vmul.f32 %v3558_v61, %v3550_v40 }
 0x51c   :  { %v660_v60 = vpop.xlane.xlu1 %659 }
 0x51d   :  { %3559 = vrcp.f32 %v660_v60 }
 0x520   :  { %v758_v3 = vpop.permute.xlu1 %757 }
 0x52a   :  { %v3560_v62 = vpop.eup %3559 }
 0x52b   :  { %v666_v63 = vmul.f32 %v3560_v62, %v3552_v46 }
 0x52d   :  { %3326 = vmatprep.mubr.msk.f32.mxu0 %vm441_vm2, %v666_v63 }
 0x52e   :  { %3327 = vmatmul.mubr.msk.f32.vlgmr.msra.gmra.mxu0 %vm441_vm2, %v667_v0 }
 0x52f   :  { %3330 = vmatpush3.xpose.msk.msra.mxu0 %vm351_vm1, %v762_v58  ;;  %3333 = vmatprep.mubr.msk.f32.mxu0 %vm351_vm1, %v756_v1 }
 0x530   :  { %3331 = vmatprep.subr.msk.mxu0 %vm351_vm1, %v760_v59 }
 0x533   :  { %3332 = vmatpush3.xpose.msk.msra.mxu0 %vm351_vm1, %v760_v59 }
 0x536   :  { %3334 = vmatmul.mubr.msk.f32.vlgmr.msra.gmra.mxu0 %vm351_vm1, %v758_v3 }
 0x5b9   :  { %v3928_v4 = vpop.f32.mrf.mxu0 }
 0x5bb   :  { %v3930_v6 = vpop.f32.mrf.mxu0 }
 0x5ee   :  { %v3932_v11 = vpop.f32.mrf.mxu0 }
 0x5f0   :  { %v3934_v15 = vpop.f32.mrf.mxu0 }
 0x5f6   :  { %v3335_v16 = vpop.f32.mrf.mxu0 }
 0x5f7   :  { %v847_v17 = vmul.f32 0.35355338, %v3335_v16 }
 0x5f8   :  { %v837_v21 = vpop.f32.mrf.mxu0 }
 0x5f9   :  { %v846_v22 = vmul.f32 0.35355338, %v837_v21  ;;  %v849_v23 = vadd.f32 %v847_v17, %v3883_v52 }
 0x5fb   :  { %v853_v25 = vsel %vm441_vm2, %v849_v23, -inf  ;;  %v848_v26 = vadd.f32 %v846_v22, %v3888_v55 }
 0x5fc   :  { %854 = vmax.xlane.f32.xlu1 %v853_v25 }
 0x5fd   :  { %v850_v27 = vsel %vm441_vm2, %v848_v26, -inf }
 0x5fe   :  { %851 = vmax.xlane.f32.xlu0 %v850_v27 }
 0x60d   :  { %874 = vrot.lane.b32.xlu1 %v3799_v19, %s3658_s28 }
 0x611   :  { %965 = vrot.lane.b32.xlu1 %v3845_v38, %s3659_s29 }
 0x615   :  { %963 = vrot.lane.b32.xlu1 %v3851_v41, %s3659_s29 }
 0x619   :  { %961 = vrot.lane.b32.xlu1 %v3864_v44, %s3660_s30 }
 0x685   :  { %v855_v30 = vpop.xlane.xlu1 %854 }
 0x686   :  { %v857_v31 = vsub.f32 %v849_v23, %v855_v30 }
 0x687   :  { %v852_v32 = vpop.xlane.xlu0 %851 }
 0x688   :  { %v860_v33 = vmul.f32 1.442695, %v857_v31  ;;  %v856_v35 = vsub.f32 %v848_v26, %v852_v32 }
 0x689   :  { %v875_v37 = vpop.permute.xlu1 %874 }
 0x68a   :  { %3561 = vpow2.f32 %v860_v33  ;;  %v858_v39 = vmul.f32 1.442695, %v856_v35  ;;  %3336 = vmatprep.subr.mxu1 %v875_v37 }
 0x68b   :  { %3337 = vmatpush3.msra.mxu1 %v875_v37  ;;  %v52_v37 = vld [vmem:[%s4388_s5 + $0x10] sm:$0xff] }
 0x68c   :  { %3563 = vpow2.f32 %v858_v39  ;;  %v51_v39 = vld [vmem:[%s4388_s5 + $0x8] sm:$0xff] }
 0x68d   :  { %v966_v46 = vpop.permute.xlu1 %965 }
 0x697   :  { %v3562_v40 = vpop.eup %3561 }
 0x698   :  { %v865_v38 = vsel %vm441_vm2, %v3562_v40, 0.0 }
 0x699   :  { %v3564_v42 = vpop.eup %3563  ;;  %866 = vadd.xlane.f32.xlu0 %v865_v38 }
 0x69a   :  { %v862_v41 = vsel %vm441_vm2, %v3564_v42, 0.0 }
 0x69d   :  { %863 = vadd.xlane.f32.xlu0 %v862_v41 }
 0x6b3   :  { %872 = vrot.lane.b32.xlu0 %v3797_v18, %s3658_s28 }
 0x6b7   :  { %959 = vrot.lane.b32.xlu0 %v3826_v28, %s3660_s30  ;;  %v964_v28 = vpop.permute.xlu1 %963 }
 0x6bb   :  { %v962_v53 = vpop.permute.xlu1 %961 }
 0x722   :  { %v867_v44 = vpop.xlane.xlu0 %866 }
 0x723   :  { %3565 = vrcp.f32 %v867_v44 }
 0x726   :  { %v864_v43 = vpop.xlane.xlu0 %863 }
 0x727   :  { %3567 = vrcp.f32 %v864_v43 }
 0x72a   :  { %v873_v45 = vpop.permute.xlu0 %872 }
 0x72b   :  { %3338 = vmatprep.subr.mxu1 %v873_v45 }
 0x72c   :  { %3339 = vmatpush3.msra.mxu1 %v873_v45 }
 0x72d   :  { %3343 = vmatprep.subr.msk.mxu1 %vm351_vm1, %v966_v46 }
 0x72e   :  { %v960_v51 = vpop.permute.xlu0 %959 }
 0x730   :  { %v3566_v47 = vpop.eup %3565 }
 0x731   :  { %v871_v50 = vmul.f32 %v3566_v47, %v3562_v40  ;;  %v50_v40 = vld [vmem:[%s4388_s5] sm:$0xff] }
 0x734   :  { %v3568_v48 = vpop.eup %3567 }
 0x735   :  { %v870_v49 = vmul.f32 %v3568_v48, %v3564_v42 }
 0x737   :  { %3340 = vmatprep.mubr.msk.f32.mxu1 %vm441_vm2, %v870_v49 }
 0x738   :  { %3341 = vmatmul.mubr.msk.f32.vlgmr.msra.gmra.mxu1 %vm441_vm2, %v871_v50 }
 0x739   :  { %3344 = vmatpush3.xpose.msk.msra.mxu1 %vm351_vm1, %v966_v46  ;;  %3347 = vmatprep.mubr.msk.f32.mxu1 %vm351_vm1, %v960_v51 }
 0x73a   :  { %3345 = vmatprep.subr.msk.mxu1 %vm351_vm1, %v964_v28 }
 0x73d   :  { %3346 = vmatpush3.xpose.msk.msra.mxu1 %vm351_vm1, %v964_v28 }
 0x740   :  { %3348 = vmatmul.mubr.msk.f32.vlgmr.msra.gmra.mxu1 %vm351_vm1, %v962_v53 }
 0x7f8   :  { %v3342_v54 = vpop.f32.mrf.mxu1 }
 0x7fa   :  { %v950_v56 = vpop.f32.mrf.mxu1 }
 0x800   :  { %v3349_v57 = vpop.f32.mrf.mxu1 }
 0x801   :  { %v1051_v58 = vmul.f32 0.35355338, %v3349_v57 }
 0x802   :  { %v1041_v59 = vpop.f32.mrf.mxu1 }
 0x803   :  { %v1050_v60 = vmul.f32 0.35355338, %v1041_v59  ;;  %v1053_v61 = vadd.f32 %v1051_v58, %v3883_v52 }
 0x805   :  { %v1057_v62 = vsel %vm441_vm2, %v1053_v61, -inf  ;;  %v1052_v63 = vadd.f32 %v1050_v60, %v3888_v55 }
 0x806   :  { %1058 = vmax.xlane.f32.xlu1 %v1057_v62 }
 0x807   :  { %v1054_v0 = vsel %vm441_vm2, %v1052_v63, -inf }
 0x808   :  { %1055 = vmax.xlane.f32.xlu0 %v1054_v0 }
 0x817   :  { %1078 = vrot.lane.b32.xlu1 %v3799_v19, %s3661_s10 }
 0x81b   :  { %1165 = vrot.lane.b32.xlu1 %v3934_v15, %s3662_s11 }
 0x81f   :  { %1167 = vrot.lane.b32.xlu1 %v3932_v11, %s3662_s11 }
 0x823   :  { %1175 = vrot.lane.b32.xlu1 %v3342_v54, %s3663_s12 }
 0x88f   :  { %v1059_v1 = vpop.xlane.xlu1 %1058 }
 0x890   :  { %v1061_v3 = vsub.f32 %v1053_v61, %v1059_v1 }
 0x891   :  { %v1056_v16 = vpop.xlane.xlu0 %1055 }
 0x892   :  { %v1064_v17 = vmul.f32 1.442695, %v1061_v3  ;;  %v1060_v21 = vsub.f32 %v1052_v63, %v1056_v16 }
 0x893   :  { %v1079_v22 = vpop.permute.xlu1 %1078 }
 0x894   :  { %3569 = vpow2.f32 %v1064_v17  ;;  %v1062_v23 = vmul.f32 1.442695, %v1060_v21  ;;  %3350 = vmatprep.subr.mxu0 %v1079_v22 }
 0x895   :  { %3351 = vmatpush3.msra.mxu0 %v1079_v22 }
 0x896   :  { %3571 = vpow2.f32 %v1062_v23 }
 0x897   :  { %v1166_v41 = vpop.permute.xlu1 %1165 }
 0x898   :  { %v1187_v46 = vsel %vm351_vm1, %v3930_v6, %v1166_v41  ;;  %v1196_v6 = vsub.s32 1, %v3786_v12 }
 0x89a   :  { %v1197_v54 = vrot.slane %v3792_v14, %v1196_v6 }
 0x89b   :  { %v1168_v44 = vpop.permute.xlu1 %1167 }
 0x89c   :  { %v1188_v48 = vsel %vm351_vm1, %v3928_v4, %v1168_v44 }
 0x89f   :  { %v1176_v43 = vpop.permute.xlu1 %1175 }
 0x8a0   :  { %v1190_v51 = vsel %vm441_vm2, %v1188_v48, %v1176_v43 }
 0x8a1   :  { %v3570_v19 = vpop.eup %3569 }
 0x8a2   :  { %v1069_v15 = vsel %vm441_vm2, %v3570_v19, 0.0 }
 0x8a3   :  { %v3572_v25 = vpop.eup %3571  ;;  %1070 = vadd.xlane.f32.xlu0 %v1069_v15  ;;  %v55_v15 = vld [vmem:[%s4389_s6 + $0x8] sm:$0xff] }
 0x8a4   :  { %v1066_v11 = vsel %vm441_vm2, %v3572_v25, 0.0 }
 0x8a7   :  { %1067 = vadd.xlane.f32.xlu0 %v1066_v11  ;;  %v65_v11 = vld [vmem:[%s4390_s7 + $0x38] sm:$0xff] }
 0x8bd   :  { %1076 = vrot.lane.b32.xlu0 %v3797_v18, %s3661_s10  ;;  %v53_v18 = vld [vmem:[%s4388_s5 + $0x18] sm:$0xff] }
 0x8c1   :  { %1173 = vrot.lane.b32.xlu0 %v950_v56, %s3663_s12 }
 0x92c   :  { %v1071_v26 = vpop.xlane.xlu0 %1070 }
 0x92d   :  { %3573 = vrcp.f32 %v1071_v26  ;;  %v64_v26 = vld [vmem:[%s4390_s7 + $0x30] sm:$0xff] }
 0x930   :  { %v1068_v27 = vpop.xlane.xlu0 %1067 }
 0x931   :  { %3575 = vrcp.f32 %v1068_v27  ;;  %v63_v27 = vld [vmem:[%s4390_s7 + $0x28] sm:$0xff] }
 0x934   :  { %v1077_v30 = vpop.permute.xlu0 %1076 }
 0x935   :  { %3352 = vmatprep.subr.mxu0 %v1077_v30 }
 0x936   :  { %3353 = vmatpush3.msra.mxu0 %v1077_v30  ;;  %v62_v30 = vld [vmem:[%s4390_s7 + $0x20] sm:$0xff] }
 0x937   :  { %3357 = vmatprep.subr.mxu0 %v53_v18 }
 0x938   :  { %v1174_v45 = vpop.permute.xlu0 %1173 }
 0x939   :  { %v1189_v49 = vsel %vm441_vm2, %v1187_v46, %v1174_v45 }
 0x93a   :  { %v3574_v31 = vpop.eup %3573 }
 0x93b   :  { %v1075_v35 = vmul.f32 %v3574_v31, %v3570_v19  ;;  %v56_v19 = vld [vmem:[%s4389_s6 + $0x10] sm:$0xff] }
 0x93e   :  { %v3576_v32 = vpop.eup %3575 }
 0x93f   :  { %v1074_v33 = vmul.f32 %v3576_v32, %v3572_v25  ;;  %v54_v25 = vld [vmem:[%s4389_s6] sm:$0xff] }
 0x941   :  { %3354 = vmatprep.mubr.msk.f32.mxu0 %vm441_vm2, %v1074_v33 }
 0x942   :  { %3355 = vmatmul.mubr.msk.f32.vlgmr.msra.gmra.mxu0 %vm441_vm2, %v1075_v35 }
 0x943   :  { %3358 = vmatpush3.msra.mxu0 %v53_v18 }
 0x944   :  { %3359 = vmatprep.subr.mxu0 %v52_v37 }
 0x945   :  { %3360 = vmatpush3.msra.mxu0 %v52_v37 }
 0x946   :  { %3361 = vmatprep.subr.mxu0 %v51_v39 }
 0x947   :  { %3362 = vmatpush3.msra.mxu0 %v51_v39  ;;  %v1310_v39 = vsub.s32 4, %v3786_v12 }
 0x948   :  { %3363 = vmatprep.subr.mxu0 %v50_v40 }
 0x949   :  { %3364 = vmatpush3.msra.mxu0 %v50_v40  ;;  %v1316_v40 = vsub.s32 5, %v3786_v12 }
 0x94a   :  { %3379 = vmatprep.subr.mxu0 %v65_v11 }
 0x94b   :  { %v1317_v44 = vrot.slane %v3792_v14, %v1316_v40 }
 0xa02   :  { %v3356_v38 = vpop.f32.mrf.mxu0 }
 0xa03   :  { %1183 = vrot.lane.b32.xlu1 %v3356_v38, %s3664_s24  ;;  %v1311_v38 = vrot.slane %v3792_v14, %v1310_v39 }
 0xa04   :  { %v1154_v42 = vpop.f32.mrf.mxu0 }
 0xa05   :  { %1181 = vrot.lane.b32.xlu0 %v1154_v42, %s3664_s24 }
 0xa75   :  { %v1184_v47 = vpop.permute.xlu1 %1183 }
 0xa76   :  { %v1193_v53 = vsel %vm1191_vm3, %v1190_v51, %v1184_v47  ;;  %v60_v51 = vld [vmem:[%s4390_s7 + $0x10] sm:$0xff] }
 0xa77   :  { %v1182_v50 = vpop.permute.xlu0 %1181 }
 0xa78   :  { %v1192_v28 = vsel %vm1191_vm3, %v1189_v49, %v1182_v50  ;;  %v61_v50 = vld [vmem:[%s4390_s7 + $0x18] sm:$0xff] }
 0xa79   :  { %3365 = vmatprep.mubr.msk.f32.mxu0 %vm71_vm0, %v1192_v28  ;;  %v59_v28 = vld [vmem:[%s4390_s7 + $0x8] sm:$0xff] }
 0xa7a   :  { %3366 = vmatmul.mubr.msk.f32.vlgmr.msra.gmra.mxu0 %vm71_vm0, %v1193_v53  ;;  %v58_v53 = vld [vmem:[%s4390_s7] sm:$0xff] }
 0xa7b   :  { %3380 = vmatpush3.msra.mxu0 %v65_v11 }
 0xa7c   :  { %3381 = vmatprep.subr.mxu0 %v64_v26 }
 0xa7d   :  { %3382 = vmatpush3.msra.mxu0 %v64_v26 }
 0xa7e   :  { %3383 = vmatprep.subr.mxu0 %v63_v27 }
 0xa7f   :  { %3384 = vmatpush3.msra.mxu0 %v63_v27 }
 0xa80   :  { %3385 = vmatprep.subr.mxu0 %v62_v30 }
 0xa81   :  { %3386 = vmatpush3.msra.mxu0 %v62_v30 }
 0xa82   :  { %3387 = vmatprep.subr.mxu0 %v61_v50 }
 0xa83   :  { %3388 = vmatpush3.msra.mxu0 %v61_v50 }
 0xa84   :  { %3389 = vmatprep.subr.mxu0 %v60_v51 }
 0xa85   :  { %3390 = vmatpush3.msra.mxu0 %v60_v51 }
 0xa86   :  { %3391 = vmatprep.subr.mxu0 %v59_v28 }
 0xa87   :  { %3392 = vmatpush3.msra.mxu0 %v59_v28 }
 0xa88   :  { %3393 = vmatprep.subr.mxu0 %v58_v53 }
 0xa89   :  { %3394 = vmatpush3.msra.mxu0 %v58_v53 }
 0xa8a   :  { %3420 = vmatprep.subr.mxu0 %v3743_v5 }
 0xb3a   :  { %v3367_v4 = vpop.f32.mrf.mxu0 }
 0xb3b   :  { %v1276_v56 = vadd.f32 %v3367_v4, %v1197_v54 }
 0xb3c   :  { %v1270_v57 = vpop.f32.mrf.mxu0 }
 0xb3d   :  { %v1271_v58 = vadd.f32 %v1270_v57, %v1197_v54  ;;  %v1280_v59 = vadd.f32 %v1276_v56, %v3753_v7  ;;  %v1322_v54 = vsub.s32 2, %v3786_v12 }
 0xb3f   :  { %v1284_v60 = vsel %vm71_vm0, %v1280_v59, 0.0  ;;  %v1279_v61 = vadd.f32 %v1271_v58, %v3726_v2  ;;  %v57_v2 = vld [vmem:[%s4389_s6 + $0x18] sm:$0xff]  ;;  %v1323_v4 = vrot.slane %v3792_v14, %v1322_v54 }
 0xb40   :  { %1285 = vadd.xlane.f32.xlu1 %v1284_v60  ;;  %3368 = vmatprep.subr.mxu1 %v57_v2 }
 0xb41   :  { %v1281_v62 = vsel %vm71_vm0, %v1279_v61, 0.0  ;;  %3369 = vmatpush3.msra.mxu1 %v57_v2 }
 0xb42   :  { %1282 = vadd.xlane.f32.xlu0 %v1281_v62  ;;  %3370 = vmatprep.subr.mxu1 %v56_v19  ;;  %v1409_v62 = vsub.s32 3, %v3786_v12 }
 0xb43   :  { %3371 = vmatpush3.msra.mxu1 %v56_v19 }
 0xb44   :  { %3372 = vmatprep.subr.mxu1 %v55_v15 }
 0xb45   :  { %3373 = vmatpush3.msra.mxu1 %v55_v15 }
 0xb46   :  { %3374 = vmatprep.subr.mxu1 %v54_v25 }
 0xb47   :  { %3375 = vmatpush3.msra.mxu1 %v54_v25 }
 0xbc9   :  { %v1286_v63 = vpop.xlane.xlu1 %1285 }
 0xbca   :  { %v1289_v0 = vmul.f32 0.03125, %v1286_v63  ;;  %v1410_v63 = vrot.slane %v3792_v14, %v1409_v62 }
 0xbcb   :  { %v1283_v1 = vpop.xlane.xlu0 %1282 }
 0xbcc   :  { %v1288_v3 = vmul.f32 0.03125, %v1283_v1  ;;  %v1291_v16 = vsub.f32 %v1280_v59, %v1289_v0 }
 0xbce   :  { %v1290_v17 = vsub.f32 %v1279_v61, %v1288_v3  ;;  %v1293_v23 = vmul.f32 %v1291_v16, %v1291_v16 }
 0xbd0   :  { %v1292_v21 = vmul.f32 %v1290_v17, %v1290_v17  ;;  %v1297_v7 = vsel %vm71_vm0, %v1293_v23, 0.0 }
 0xbd2   :  { %v1294_v22 = vsel %vm71_vm0, %v1292_v21, 0.0 }
 0xbd3   :  { %1295 = vadd.xlane.f32.xlu0 %v1294_v22 }
 0xbd7   :  { %1298 = vadd.xlane.f32.xlu0 %v1297_v7 }
 0xc5c   :  { %v1296_v31 = vpop.xlane.xlu0 %1295 }
 0xc5d   :  { %v1300_v32 = vmul.f32 0.03125, %v1296_v31 }
 0xc5f   :  { %v1302_v33 = vadd.f32 1e-05, %v1300_v32  ;;  %v3070_v32 = vld [vmem:[%s4387_s4 + $0x38] sm:$0xff] }
 0xc60   :  { %v1299_v35 = vpop.xlane.xlu0 %1298  ;;  %3398 = vmatprep.subr.mxu1 %v3070_v32 }
 0xc61   :  { %3577 = vrsqrt.f32 %v1302_v33  ;;  %v1301_v18 = vmul.f32 0.03125, %v1299_v35  ;;  %v3069_v33 = vld [vmem:[%s4387_s4 + $0x30] sm:$0xff]  ;;  %v3068_v35 = vld [vmem:[%s4387_s4 + $0x28] sm:$0xff] }
 0xc63   :  { %v1303_v37 = vadd.f32 1e-05, %v1301_v18  ;;  %v3067_v18 = vld [vmem:[%s4387_s4 + $0x20] sm:$0xff] }
 0xc65   :  { %3579 = vrsqrt.f32 %v1303_v37 }
 0xc6e   :  { %v3578_v42 = vpop.eup %3577 }
 0xc6f   :  { %v1306_v41 = vmul.f32 %v3578_v42, %v1290_v17 }
 0xc71   :  { %v1312_v43 = vmul.f32 %v1311_v38, %v1306_v41 }
 0xc72   :  { %v3580_v45 = vpop.eup %3579 }
 0xc73   :  { %v1307_v46 = vmul.f32 %v3580_v45, %v1291_v16  ;;  %v1318_v47 = vadd.f32 %v1317_v44, %v1312_v43  ;;  %v1523_v45 = vsub.s32 6, %v3786_v12 }
 0xc75   :  { %v1313_v48 = vmul.f32 %v1311_v38, %v1307_v46  ;;  %3376 = vmatprep.mubr.msk.f32.mxu1 %vm71_vm0, %v1318_v47 }
 0xc77   :  { %v1319_v49 = vadd.f32 %v1317_v44, %v1313_v48  ;;  %v1529_v48 = vsub.s32 7, %v3786_v12 }
 0xc79   :  { %3377 = vmatmul.mubr.msk.f32.vlgmr.msra.gmra.mxu1 %vm71_vm0, %v1319_v49  ;;  %v1530_v53 = vrot.slane %v3792_v14, %v1529_v48 }
 0xc7a   :  { %3399 = vmatpush3.msra.mxu1 %v3070_v32 }
 0xc7b   :  { %3400 = vmatprep.subr.mxu1 %v3069_v33 }
 0xc7c   :  { %3401 = vmatpush3.msra.mxu1 %v3069_v33 }
 0xc7d   :  { %3402 = vmatprep.subr.mxu1 %v3068_v35 }
 0xc7e   :  { %3403 = vmatpush3.msra.mxu1 %v3068_v35 }
 0xc7f   :  { %3404 = vmatprep.subr.mxu1 %v3067_v18 }
 0xc80   :  { %3405 = vmatpush3.msra.mxu1 %v3067_v18 }
 0xc81   :  { %3409 = vmatprep.subr.mxu1 %v3743_v5 }
 0xd39   :  { %v3378_v56 = vpop.f32.mrf.mxu1 }
 0xd3a   :  { %v1402_v57 = vadd.f32 %v3378_v56, %v1323_v4 }
 0xd3b   :  { %v1396_v58 = vpop.f32.mrf.mxu1 }
 0xd3c   :  { %v1397_v59 = vadd.f32 %v1396_v58, %v1323_v4  ;;  %v1406_v61 = vmax.f32 %v1402_v57, 0.0 }
 0xd3e   :  { %v1405_v60 = vmax.f32 %v1397_v59, 0.0 }
 0xd40   :  { %3395 = vmatprep.mubr.msk.f32.mxu0 %vm1411_vm4, %v1405_v60 }
 0xd41   :  { %3396 = vmatmul.mubr.msk.f32.vlgmr.msra.gmra.mxu0 %vm1411_vm4, %v1406_v61 }
 0xd42   :  { %3421 = vmatpush3.msra.mxu0 %v3743_v5 }
 0xd43   :  { %3422 = vmatprep.subr.mxu0 %v3762_v8 }
 0xd44   :  { %3423 = vmatpush3.msra.mxu0 %v3762_v8 }
 0xd45   :  { %3424 = vmatprep.subr.mxu0 %v3770_v9 }
 0xd46   :  { %3425 = vmatpush3.msra.mxu0 %v3770_v9 }
 0xd47   :  { %3426 = vmatprep.subr.mxu0 %v3779_v10 }
 0xd48   :  { %3427 = vmatpush3.msra.mxu0 %v3779_v10 }
 0xe01   :  { %v3397_v0 = vpop.f32.mrf.mxu0 }
 0xe02   :  { %v1490_v1 = vadd.f32 %v3397_v0, %v1410_v63 }
 0xe03   :  { %v1484_v3 = vpop.f32.mrf.mxu0 }
 0xe04   :  { %v1485_v16 = vadd.f32 %v1484_v3, %v1410_v63  ;;  %v1494_v17 = vadd.f32 %v1490_v1, %v1319_v49 }
 0xe06   :  { %v1498_v21 = vsel %vm71_vm0, %v1494_v17, 0.0  ;;  %v1493_v22 = vadd.f32 %v1485_v16, %v1318_v47  ;;  %v1524_v47 = vrot.slane %v3792_v14, %v1523_v45  ;;  %v4121_v14 = vld [vmem:[%s4391_s8 + $0x8] sm:$0xff] }
 0xe07   :  { %1499 = vadd.xlane.f32.xlu0 %v1498_v21 }
 0xe08   :  { %v1495_v23 = vsel %vm71_vm0, %v1493_v22, 0.0 }
 0xe09   :  { %1496 = vadd.xlane.f32.xlu1 %v1495_v23 }
 0xe90   :  { %v1500_v7 = vpop.xlane.xlu0 %1499 }
 0xe91   :  { %v1502_v2 = vmul.f32 0.03125, %v1500_v7 }
 0xe92   :  { %v1497_v19 = vpop.xlane.xlu1 %1496 }
 0xe93   :  { %v1504_v15 = vsub.f32 %v1494_v17, %v1502_v2  ;;  %v1501_v25 = vmul.f32 0.03125, %v1497_v19 }
 0xe95   :  { %v1503_v11 = vsub.f32 %v1493_v22, %v1501_v25  ;;  %v1506_v26 = vmul.f32 %v1504_v15, %v1504_v15 }
 0xe97   :  { %v1510_v27 = vsel %vm71_vm0, %v1506_v26, 0.0  ;;  %v1505_v30 = vmul.f32 %v1503_v11, %v1503_v11 }
 0xe98   :  { %1511 = vadd.xlane.f32.xlu0 %v1510_v27 }
 0xe99   :  { %v1507_v31 = vsel %vm71_vm0, %v1505_v30, 0.0 }
 0xe9a   :  { %1508 = vadd.xlane.f32.xlu1 %v1507_v31 }
 0xf21   :  { %v1512_v37 = vpop.xlane.xlu0 %1511 }
 0xf22   :  { %v1514_v38 = vmul.f32 0.03125, %v1512_v37 }
 0xf23   :  { %v1509_v42 = vpop.xlane.xlu1 %1508 }
 0xf24   :  { %v1516_v41 = vadd.f32 1e-05, %v1514_v38  ;;  %v1513_v44 = vmul.f32 0.03125, %v1509_v42 }
 0xf26   :  { %3581 = vrsqrt.f32 %v1516_v41  ;;  %v1515_v43 = vadd.f32 1e-05, %v1513_v44 }
 0xf28   :  { %3583 = vrsqrt.f32 %v1515_v43 }
 0xf33   :  { %v3582_v46 = vpop.eup %3581 }
 0xf34   :  { %v1520_v49 = vmul.f32 %v3582_v46, %v1504_v15 }
 0xf35   :  { %v3584_v50 = vpop.eup %3583 }
 0xf36   :  { %v1519_v51 = vmul.f32 %v3584_v50, %v1503_v11  ;;  %v1526_v28 = vmul.f32 %v1524_v47, %v1520_v49 }
 0xf38   :  { %v1525_v4 = vmul.f32 %v1524_v47, %v1519_v51  ;;  %v4105_v57 = vadd.f32 %v1530_v53, %v1526_v28 }
 0xf3a   :  { %v4103_v56 = vadd.f32 %v1530_v53, %v1525_v4 }
 0xf3c   :  { %3406 = vmatprep.mubr.msk.f32.mxu1 %vm71_vm0, %v4103_v56 }
 0xf3d   :  { %3407 = vmatmul.mubr.msk.f32.vlgmr.msra.gmra.mxu1 %vm71_vm0, %v4105_v57 }
 0xf3e   :  { %3410 = vmatpush3.msra.mxu1 %v3743_v5  ;;  %v1562_v5 = vrot.slane %v4121_v14, %v69_v13 }
 0xf3f   :  { %3411 = vmatprep.subr.mxu1 %v3762_v8 }
 0xf40   :  { %3412 = vmatpush3.msra.mxu1 %v3762_v8 }
 0xf41   :  { %3413 = vmatprep.subr.mxu1 %v3770_v9 }
 0xf42   :  { %3414 = vmatpush3.msra.mxu1 %v3770_v9 }
 0xf43   :  { %3415 = vmatprep.subr.mxu1 %v3779_v10 }
 0xf44   :  { %3416 = vmatpush3.msra.mxu1 %v3779_v10 }
 0xffd   :  { %v3408_v58 = vpop.f32.mrf.mxu1 }
 0xffe   :  { %v4126_v59 = vadd.f32 %v3408_v58, %v1562_v5 }
 0xfff   :  { %v1635_v8 = vpop.f32.mrf.mxu1 }
0x1000   :  { %v4128_v60 = vadd.f32 %v1635_v8, %v1562_v5  ;;  %1735 = vrot.lane.b32.xlu0 %v4126_v59, %s3651_s3 }
0x1002   :  { %1733 = vrot.lane.b32.xlu1 %v4128_v60, %s3651_s3  ;;  %3417 = vmatprep.mubr.msk.f32.mxu1 %vm71_vm0, %v4128_v60  ;;  %v1644_v63 = vmul.f32 %v4128_v60, %v3812_v20  ;;  %v1732_v20 = vmul.f32 %v4126_v59, %v3839_v34  ;;  %v1731_v7 = vmul.f32 %v4128_v60, %v3843_v36  ;;  %v3625_v34 = vld [vmem:[%s4384_s1 + $0x8] sm:$0xff] }
0x1003   :  { %3418 = vmatmul.mubr.msk.f32.vlgmr.msra.gmra.mxu1 %vm71_vm0, %v4126_v59  ;;  %v1645_v15 = vmul.f32 %v3625_v34, %v4126_v59 }
0x1072   :  { %v1736_v10 = vpop.permute.xlu0 %1735 }
0x1074   :  { %v1734_v9 = vpop.permute.xlu1 %1733 }
0x1075   :  { %3428 = vmatprep.mubr.msk.f32.mxu0 %vm71_vm0, %v1734_v9 }
0x1076   :  { %3429 = vmatmul.mubr.msk.f32.vlgmr.msra.gmra.mxu0 %vm71_vm0, %v1736_v10 }
0x10c3   :  { %v3419_v13 = vpop.f32.mrf.mxu1 }
0x10c5   :  { %v1718_v61 = vpop.f32.mrf.mxu1 }
0x10c6   :  { %v1727_v0 = vmul.f32 %v3821_v24, %v1718_v61 }
0x10c8   :  { %v4143_v1 = vadd.f32 %v1727_v0, %v1644_v63 }
0x10ca   :  { %3435 = vmatprep.mubr.msk.f32.mxu1 %vm351_vm1, %v4143_v1 }
0x1136   :  { %v3430_v3 = vpop.f32.mrf.mxu0 }
0x1137   :  { %v1817_v16 = vmul.f32 %v3430_v3, %v3833_v29 }
0x1138   :  { %v1807_v17 = vpop.f32.mrf.mxu0 }
0x1139   :  { %1822 = vrot.lane.b32.xlu1 %v1817_v16, %s3650_s19  ;;  %v1816_v21 = vmul.f32 %v3821_v24, %v1807_v17  ;;  %v1728_v24 = vmul.f32 %v3419_v13, %v3833_v29 }
0x113b   :  { %v4174_v36 = vadd.f32 %v1728_v24, %v1645_v15 }
0x113d   :  { %1820 = vrot.lane.b32.xlu1 %v1816_v21, %s3650_s19 }
0x11ab   :  { %v1823_v22 = vpop.permute.xlu1 %1822 }
0x11ac   :  { %v4153_v23 = vadd.f32 %v1823_v22, %v1732_v20 }
0x11ae   :  { %1832 = vrot.lane.b32.xlu0 %v4153_v23, %s3651_s3 }
0x11af   :  { %v1821_v2 = vpop.permute.xlu1 %1820 }
0x11b0   :  { %v4159_v19 = vadd.f32 %v1821_v2, %v1731_v7 }
0x11b2   :  { %2038 = vrot.lane.b32.xlu0 %v4153_v23, %s3652_s18  ;;  %1830 = vrot.lane.b32.xlu1 %v4159_v19, %s3651_s3 }
0x11b6   :  { %2036 = vrot.lane.b32.xlu1 %v4159_v19, %s3652_s18  ;;  %2032 = vrot.lane.b32.xlu0 %v4143_v1, %s3653_s20 }
0x11ba   :  { %2034 = vrot.lane.b32.xlu1 %v4174_v36, %s3653_s20 }
0x1220   :  { %v1833_v25 = vpop.permute.xlu0 %1832 }
0x1221   :  { %3431 = vmatprep.subr.msk.mxu1 %vm351_vm1, %v1833_v25 }
0x1222   :  { %3432 = vmatpush3.xpose.msk.msra.mxu1 %vm351_vm1, %v1833_v25 }
0x1224   :  { %v2039_v29 = vpop.permute.xlu0 %2038  ;;  %v1831_v11 = vpop.permute.xlu1 %1830 }
0x1225   :  { %3433 = vmatprep.subr.msk.mxu1 %vm351_vm1, %v1831_v11 }
0x1226   :  { %3434 = vmatpush3.xpose.msk.msra.mxu1 %vm351_vm1, %v1831_v11 }
0x1227   :  { %3445 = vmatprep.subr.msk.mxu1 %vm351_vm1, %v2039_v29 }
0x1228   :  { %v2033_v26 = vpop.permute.xlu0 %2032  ;;  %v2037_v27 = vpop.permute.xlu1 %2036 }
0x1229   :  { %3436 = vmatmul.mubr.msk.f32.vlgmr.msra.gmra.mxu1 %vm351_vm1, %v4174_v36 }
0x122a   :  { %3446 = vmatpush3.xpose.msk.msra.mxu1 %vm351_vm1, %v2039_v29  ;;  %3449 = vmatprep.mubr.msk.f32.mxu1 %vm351_vm1, %v2033_v26 }
0x122b   :  { %3447 = vmatprep.subr.msk.mxu1 %vm351_vm1, %v2037_v27 }
0x122c   :  { %v2035_v30 = vpop.permute.xlu1 %2034 }
0x122e   :  { %3448 = vmatpush3.xpose.msk.msra.mxu1 %vm351_vm1, %v2037_v27 }
0x1231   :  { %3450 = vmatmul.mubr.msk.f32.vlgmr.msra.gmra.mxu1 %vm351_vm1, %v2035_v30 }
0x12e9   :  { %v3437_v31 = vpop.f32.mrf.mxu1 }
0x12ea   :  { %v1920_v32 = vmul.f32 0.35355338, %v3437_v31 }
0x12eb   :  { %v1910_v33 = vpop.f32.mrf.mxu1 }
0x12ec   :  { %v1919_v35 = vmul.f32 0.35355338, %v1910_v33  ;;  %v1922_v18 = vadd.f32 %v1920_v32, %v3883_v52 }
0x12ee   :  { %v1926_v37 = vsel %vm441_vm2, %v1922_v18, -inf  ;;  %v1921_v38 = vadd.f32 %v1919_v35, %v3888_v55 }
0x12ef   :  { %1927 = vmax.xlane.f32.xlu1 %v1926_v37 }
0x12f0   :  { %v1923_v42 = vsel %vm441_vm2, %v1921_v38, -inf }
0x12f1   :  { %v3451_v41 = vpop.f32.mrf.mxu1  ;;  %1924 = vmax.xlane.f32.xlu0 %v1923_v42 }
0x12f2   :  { %v2124_v43 = vmul.f32 0.35355338, %v3451_v41 }
0x12f3   :  { %v2114_v44 = vpop.f32.mrf.mxu1 }
0x12f4   :  { %v2123_v46 = vmul.f32 0.35355338, %v2114_v44  ;;  %v2126_v50 = vadd.f32 %v2124_v43, %v3883_v52 }
0x12f6   :  { %v2125_v47 = vadd.f32 %v2123_v46, %v3888_v55  ;;  %v2130_v51 = vsel %vm441_vm2, %v2126_v50, -inf }
0x12f8   :  { %v2127_v49 = vsel %vm441_vm2, %v2125_v47, -inf }
0x12f9   :  { %2128 = vmax.xlane.f32.xlu0 %v2127_v49 }
0x12fd   :  { %2131 = vmax.xlane.f32.xlu0 %v2130_v51 }
0x1300   :  { %1947 = vrot.lane.b32.xlu1 %v4126_v59, %s3654_s25 }
0x1304   :  { %2151 = vrot.lane.b32.xlu1 %v4126_v59, %s3655_s26 }
0x1308   :  { %2149 = vrot.lane.b32.xlu1 %v4128_v60, %s3655_s26 }
0x1313   :  { %1945 = vrot.lane.b32.xlu0 %v4128_v60, %s3654_s25 }
0x1378   :  { %v1928_v55 = vpop.xlane.xlu1 %1927 }
0x1379   :  { %v1930_v28 = vsub.f32 %v1922_v18, %v1928_v55 }
0x137a   :  { %v1925_v53 = vpop.xlane.xlu0 %1924 }
0x137b   :  { %v1933_v52 = vmul.f32 1.442695, %v1930_v28  ;;  %v1929_v4 = vsub.f32 %v1921_v38, %v1925_v53  ;;  %v3626_v28 = vld [vmem:[%s4385_s2 + $0x8] sm:$0xff] }
0x137c   :  { %v1948_v5 = vpop.permute.xlu1 %1947 }
0x137d   :  { %3585 = vpow2.f32 %v1933_v52  ;;  %v1931_v58 = vmul.f32 1.442695, %v1929_v4  ;;  %3438 = vmatprep.subr.mxu0 %v1948_v5  ;;  %v3627_v4 = vld [vmem:[%s4385_s2] sm:$0xff] }
0x137e   :  { %3439 = vmatpush3.msra.mxu0 %v1948_v5 }
0x137f   :  { %3587 = vpow2.f32 %v1931_v58 }
0x1380   :  { %v2152_v16 = vpop.permute.xlu1 %2151 }
0x1382   :  { %v2129_v8 = vpop.xlane.xlu0 %2128 }
0x1383   :  { %v2133_v22 = vsub.f32 %v2125_v47, %v2129_v8 }
0x1384   :  { %v2150_v34 = vpop.permute.xlu1 %2149 }
0x1385   :  { %v2135_v7 = vmul.f32 1.442695, %v2133_v22 }
0x1386   :  { %v2132_v9 = vpop.xlane.xlu0 %2131 }
0x1387   :  { %v2134_v10 = vsub.f32 %v2126_v50, %v2132_v9 }
0x1389   :  { %v2137_v13 = vmul.f32 1.442695, %v2134_v10 }
0x138a   :  { %v3586_v61 = vpop.eup %3585  ;;  %v1946_v63 = vpop.permute.xlu0 %1945 }
0x138b   :  { %3589 = vpow2.f32 %v2137_v13  ;;  %3440 = vmatprep.subr.mxu0 %v1946_v63  ;;  %v1938_v0 = vsel %vm441_vm2, %v3586_v61, 0.0 }
0x138c   :  { %v3588_v3 = vpop.eup %3587  ;;  %1939 = vadd.xlane.f32.xlu0 %v1938_v0  ;;  %3441 = vmatpush3.msra.mxu0 %v1946_v63  ;;  %3591 = vpow2.f32 %v2135_v7 }
0x138d   :  { %3452 = vmatprep.subr.mxu0 %v2152_v16  ;;  %v1935_v17 = vsel %vm441_vm2, %v3588_v3, 0.0 }
0x138e   :  { %1936 = vadd.xlane.f32.xlu1 %v1935_v17 }
0x1398   :  { %v3590_v21 = vpop.eup %3589 }
0x1399   :  { %v2142_v20 = vsel %vm441_vm2, %v3590_v21, 0.0  ;;  %v3592_v2 = vpop.eup %3591 }
0x139a   :  { %2143 = vadd.xlane.f32.xlu0 %v2142_v20  ;;  %v2139_v24 = vsel %vm441_vm2, %v3592_v2, 0.0 }
0x139f   :  { %2240 = vrot.lane.b32.xlu1 %v4159_v19, %s3656_s27 }
0x13b0   :  { %2242 = vrot.lane.b32.xlu0 %v4153_v23, %s3656_s27 }
0x13b4   :  { %2236 = vrot.lane.b32.xlu0 %v4143_v1, %s3657_s0 }
0x13c3   :  { %2140 = vadd.xlane.f32.xlu1 %v2139_v24 }
0x13d4   :  { %2238 = vrot.lane.b32.xlu1 %v4174_v36, %s3657_s0 }
0x1415   :  { %v1940_v15 = vpop.xlane.xlu0 %1939 }
0x1416   :  { %3593 = vrcp.f32 %v1940_v15 }
0x1417   :  { %v1937_v25 = vpop.xlane.xlu1 %1936 }
0x1418   :  { %3595 = vrcp.f32 %v1937_v25 }
0x141b   :  { %v2241_v32 = vpop.permute.xlu1 %2240 }
0x1423   :  { %v3594_v29 = vpop.eup %3593  ;;  %v2144_v26 = vpop.xlane.xlu0 %2143 }
0x1424   :  { %v1944_v30 = vmul.f32 %v3594_v29, %v3586_v61  ;;  %3597 = vrcp.f32 %v2144_v26 }
0x1425   :  { %v3596_v11 = vpop.eup %3595 }
0x1426   :  { %v1943_v27 = vmul.f32 %v3596_v11, %v3588_v3 }
0x1427   :  { %v2243_v31 = vpop.permute.xlu0 %2242 }
0x1428   :  { %3442 = vmatprep.mubr.msk.f32.mxu0 %vm441_vm2, %v1943_v27 }
0x1429   :  { %3443 = vmatmul.mubr.msk.f32.vlgmr.msra.gmra.mxu0 %vm441_vm2, %v1944_v30 }
0x142a   :  { %3453 = vmatpush3.msra.mxu0 %v2152_v16 }
0x142b   :  { %3454 = vmatprep.subr.mxu0 %v2150_v34  ;;  %v2237_v42 = vpop.permute.xlu0 %2236 }
0x142c   :  { %3455 = vmatpush3.msra.mxu0 %v2150_v34 }
0x142d   :  { %3459 = vmatprep.subr.msk.mxu0 %vm351_vm1, %v2243_v31 }
0x1431   :  { %v3598_v35 = vpop.eup %3597 }
0x1432   :  { %v2148_v38 = vmul.f32 %v3598_v35, %v3590_v21 }
0x144c   :  { %v2141_v33 = vpop.xlane.xlu1 %2140 }
0x144d   :  { %3599 = vrcp.f32 %v2141_v33 }
0x1450   :  { %v2239_v41 = vpop.permute.xlu1 %2238 }
0x145a   :  { %v3600_v18 = vpop.eup %3599 }
0x145b   :  { %v2147_v37 = vmul.f32 %v3600_v18, %v3592_v2 }
0x145d   :  { %3456 = vmatprep.mubr.msk.f32.mxu0 %vm441_vm2, %v2147_v37 }
0x145e   :  { %3457 = vmatmul.mubr.msk.f32.vlgmr.msra.gmra.mxu0 %vm441_vm2, %v2148_v38 }
0x145f   :  { %3460 = vmatpush3.xpose.msk.msra.mxu0 %vm351_vm1, %v2243_v31  ;;  %3463 = vmatprep.mubr.msk.f32.mxu0 %vm351_vm1, %v2237_v42 }
0x1460   :  { %3461 = vmatprep.subr.msk.mxu0 %vm351_vm1, %v2241_v32 }
0x1463   :  { %3462 = vmatpush3.xpose.msk.msra.mxu0 %vm351_vm1, %v2241_v32 }
0x1466   :  { %3464 = vmatmul.mubr.msk.f32.vlgmr.msra.gmra.mxu0 %vm351_vm1, %v2239_v41 }
0x14e9   :  { %v4228_v44 = vpop.f32.mrf.mxu0 }
0x14eb   :  { %v4230_v43 = vpop.f32.mrf.mxu0 }
0x151e   :  { %v4232_v46 = vpop.f32.mrf.mxu0 }
0x1520   :  { %v4234_v47 = vpop.f32.mrf.mxu0 }
0x1526   :  { %v3465_v49 = vpop.f32.mrf.mxu0 }
0x1527   :  { %v2328_v50 = vmul.f32 0.35355338, %v3465_v49 }
0x1528   :  { %v2318_v51 = vpop.f32.mrf.mxu0 }
0x1529   :  { %v2327_v55 = vmul.f32 0.35355338, %v2318_v51  ;;  %v2330_v53 = vadd.f32 %v3626_v28, %v2328_v50 }
0x152b   :  { %v2334_v52 = vsel %vm441_vm2, %v2330_v53, -inf  ;;  %v2329_v5 = vadd.f32 %v3627_v4, %v2327_v55 }
0x152c   :  { %2335 = vmax.xlane.f32.xlu1 %v2334_v52 }
0x152d   :  { %v2331_v58 = vsel %vm441_vm2, %v2329_v5, -inf }
0x152e   :  { %2332 = vmax.xlane.f32.xlu0 %v2331_v58 }
0x153d   :  { %2355 = vrot.lane.b32.xlu1 %v4126_v59, %s3658_s28 }
0x1541   :  { %2446 = vrot.lane.b32.xlu1 %v4153_v23, %s3659_s29 }
0x1545   :  { %2444 = vrot.lane.b32.xlu1 %v4159_v19, %s3659_s29 }
0x1549   :  { %2442 = vrot.lane.b32.xlu1 %v4174_v36, %s3660_s30 }
0x15b5   :  { %v2336_v8 = vpop.xlane.xlu1 %2335 }
0x15b6   :  { %v2338_v9 = vsub.f32 %v2330_v53, %v2336_v8  ;;  %v3073_v8 = vld [vmem:[%s4388_s5 + $0x30] sm:$0xff] }
0x15b7   :  { %v2333_v10 = vpop.xlane.xlu0 %2332 }
0x15b8   :  { %v2341_v13 = vmul.f32 1.442695, %v2338_v9  ;;  %v2337_v61 = vsub.f32 %v2329_v5, %v2333_v10  ;;  %v3072_v9 = vld [vmem:[%s4388_s5 + $0x28] sm:$0xff]  ;;  %v3071_v10 = vld [vmem:[%s4388_s5 + $0x20] sm:$0xff] }
0x15b9   :  { %v2356_v63 = vpop.permute.xlu1 %2355 }
0x15ba   :  { %3601 = vpow2.f32 %v2341_v13  ;;  %v2339_v0 = vmul.f32 1.442695, %v2337_v61  ;;  %3466 = vmatprep.subr.mxu1 %v2356_v63 }
0x15bb   :  { %3467 = vmatpush3.msra.mxu1 %v2356_v63 }
0x15bc   :  { %3603 = vpow2.f32 %v2339_v0 }
0x15bd   :  { %v2447_v20 = vpop.permute.xlu1 %2446 }
0x15c7   :  { %v3602_v3 = vpop.eup %3601 }
0x15c8   :  { %v2346_v23 = vsel %vm441_vm2, %v3602_v3, 0.0 }
0x15c9   :  { %v3604_v16 = vpop.eup %3603  ;;  %2347 = vadd.xlane.f32.xlu0 %v2346_v23 }
0x15ca   :  { %v2343_v19 = vsel %vm441_vm2, %v3604_v16, 0.0 }
0x15cd   :  { %2344 = vadd.xlane.f32.xlu0 %v2343_v19 }
0x15e3   :  { %2353 = vrot.lane.b32.xlu0 %v4128_v60, %s3658_s28 }
0x15e7   :  { %2440 = vrot.lane.b32.xlu0 %v4143_v1, %s3660_s30  ;;  %v2445_v1 = vpop.permute.xlu1 %2444 }
0x15eb   :  { %v2443_v15 = vpop.permute.xlu1 %2442 }
0x1652   :  { %v2348_v36 = vpop.xlane.xlu0 %2347 }
0x1653   :  { %3605 = vrcp.f32 %v2348_v36 }
0x1656   :  { %v2345_v17 = vpop.xlane.xlu0 %2344 }
0x1657   :  { %3607 = vrcp.f32 %v2345_v17 }
0x165a   :  { %v2354_v21 = vpop.permute.xlu0 %2353 }
0x165b   :  { %3468 = vmatprep.subr.mxu1 %v2354_v21 }
0x165c   :  { %3469 = vmatpush3.msra.mxu1 %v2354_v21 }
0x165d   :  { %3473 = vmatprep.subr.msk.mxu1 %vm351_vm1, %v2447_v20 }
0x165e   :  { %v2441_v34 = vpop.permute.xlu0 %2440 }
0x1660   :  { %v3606_v22 = vpop.eup %3605 }
0x1661   :  { %v2352_v24 = vmul.f32 %v3606_v22, %v3602_v3 }
0x1664   :  { %v3608_v7 = vpop.eup %3607 }
0x1665   :  { %v2351_v2 = vmul.f32 %v3608_v7, %v3604_v16 }
0x1667   :  { %3470 = vmatprep.mubr.msk.f32.mxu1 %vm441_vm2, %v2351_v2 }
0x1668   :  { %3471 = vmatmul.mubr.msk.f32.vlgmr.msra.gmra.mxu1 %vm441_vm2, %v2352_v24 }
0x1669   :  { %3474 = vmatpush3.xpose.msk.msra.mxu1 %vm351_vm1, %v2447_v20  ;;  %3477 = vmatprep.mubr.msk.f32.mxu1 %vm351_vm1, %v2441_v34 }
0x166a   :  { %3475 = vmatprep.subr.msk.mxu1 %vm351_vm1, %v2445_v1 }
0x166d   :  { %3476 = vmatpush3.xpose.msk.msra.mxu1 %vm351_vm1, %v2445_v1 }
0x1670   :  { %3478 = vmatmul.mubr.msk.f32.vlgmr.msra.gmra.mxu1 %vm351_vm1, %v2443_v15 }
0x1728   :  { %v3472_v25 = vpop.f32.mrf.mxu1 }
0x172a   :  { %v2431_v29 = vpop.f32.mrf.mxu1 }
0x1730   :  { %v3479_v11 = vpop.f32.mrf.mxu1 }
0x1731   :  { %v2532_v26 = vmul.f32 0.35355338, %v3479_v11 }
0x1732   :  { %v2522_v27 = vpop.f32.mrf.mxu1 }
0x1733   :  { %v2531_v30 = vmul.f32 0.35355338, %v2522_v27  ;;  %v2534_v31 = vadd.f32 %v3626_v28, %v2532_v26 }
0x1735   :  { %v2538_v32 = vsel %vm441_vm2, %v2534_v31, -inf  ;;  %v2533_v33 = vadd.f32 %v3627_v4, %v2531_v30 }
0x1736   :  { %2539 = vmax.xlane.f32.xlu1 %v2538_v32 }
0x1737   :  { %v2535_v35 = vsel %vm441_vm2, %v2533_v33, -inf }
0x1738   :  { %2536 = vmax.xlane.f32.xlu0 %v2535_v35 }
0x1747   :  { %2559 = vrot.lane.b32.xlu1 %v4126_v59, %s3661_s10 }
0x174b   :  { %2646 = vrot.lane.b32.xlu1 %v4234_v47, %s3662_s11 }
0x174f   :  { %2648 = vrot.lane.b32.xlu1 %v4232_v46, %s3662_s11 }
0x1753   :  { %2656 = vrot.lane.b32.xlu1 %v3472_v25, %s3663_s12 }
0x17bf   :  { %v2540_v18 = vpop.xlane.xlu1 %2539 }
0x17c0   :  { %v2542_v37 = vsub.f32 %v2534_v31, %v2540_v18  ;;  %v3077_v18 = vld [vmem:[%s4389_s6 + $0x30] sm:$0xff] }
0x17c1   :  { %v2537_v38 = vpop.xlane.xlu0 %2536 }
0x17c2   :  { %v2545_v42 = vmul.f32 1.442695, %v2542_v37  ;;  %v2541_v41 = vsub.f32 %v2533_v33, %v2537_v38  ;;  %v3076_v37 = vld [vmem:[%s4389_s6 + $0x28] sm:$0xff]  ;;  %v3075_v38 = vld [vmem:[%s4389_s6 + $0x20] sm:$0xff] }
0x17c3   :  { %v2560_v49 = vpop.permute.xlu1 %2559 }
0x17c4   :  { %3609 = vpow2.f32 %v2545_v42  ;;  %v2543_v50 = vmul.f32 1.442695, %v2541_v41  ;;  %3480 = vmatprep.subr.mxu0 %v2560_v49  ;;  %v3086_v42 = vld [vmem:[%s4390_s7 + $0x78] sm:$0xff]  ;;  %v3085_v41 = vld [vmem:[%s4390_s7 + $0x70] sm:$0xff] }
0x17c5   :  { %3481 = vmatpush3.msra.mxu0 %v2560_v49  ;;  %v3084_v49 = vld [vmem:[%s4390_s7 + $0x68] sm:$0xff] }
0x17c6   :  { %3611 = vpow2.f32 %v2543_v50  ;;  %v3083_v50 = vld [vmem:[%s4390_s7 + $0x60] sm:$0xff] }
0x17c7   :  { %v2647_v63 = vpop.permute.xlu1 %2646 }
0x17c8   :  { %v2668_v16 = vsel %vm351_vm1, %v4230_v43, %v2647_v63  ;;  %v2677_v43 = vrot.slane %v4121_v14, %v1196_v6  ;;  %v3079_v63 = vld [vmem:[%s4390_s7 + $0x40] sm:$0xff] }
0x17cb   :  { %v2649_v0 = vpop.permute.xlu1 %2648 }
0x17cc   :  { %v2669_v36 = vsel %vm351_vm1, %v4228_v44, %v2649_v0  ;;  %v2802_v0 = vrot.slane %v4121_v14, %v1322_v54 }
0x17cf   :  { %v2657_v3 = vpop.permute.xlu1 %2656 }
0x17d0   :  { %v2671_v20 = vsel %vm441_vm2, %v2669_v36, %v2657_v3 }
0x17d1   :  { %v3610_v59 = vpop.eup %3609 }
0x17d2   :  { %v2550_v51 = vsel %vm441_vm2, %v3610_v59, 0.0 }
0x17d3   :  { %v3612_v47 = vpop.eup %3611  ;;  %2551 = vadd.xlane.f32.xlu0 %v2550_v51 }
0x17d4   :  { %v2547_v46 = vsel %vm441_vm2, %v3612_v47, 0.0 }
0x17d7   :  { %2548 = vadd.xlane.f32.xlu0 %v2547_v46 }
0x17ed   :  { %2557 = vrot.lane.b32.xlu0 %v4128_v60, %s3661_s10  ;;  %v3074_v60 = vld [vmem:[%s4388_s5 + $0x38] sm:$0xff] }
0x17f1   :  { %2654 = vrot.lane.b32.xlu0 %v2431_v29, %s3663_s12 }
0x185c   :  { %v2552_v55 = vpop.xlane.xlu0 %2551 }
0x185d   :  { %3613 = vrcp.f32 %v2552_v55 }
0x1860   :  { %v2549_v28 = vpop.xlane.xlu0 %2548 }
0x1861   :  { %3615 = vrcp.f32 %v2549_v28 }
0x1864   :  { %v2558_v53 = vpop.permute.xlu0 %2557 }
0x1865   :  { %3482 = vmatprep.subr.mxu0 %v2558_v53 }
0x1866   :  { %3483 = vmatpush3.msra.mxu0 %v2558_v53  ;;  %v2790_v53 = vrot.slane %v4121_v14, %v1310_v39  ;;  %v3082_v39 = vld [vmem:[%s4390_s7 + $0x58] sm:$0xff] }
0x1867   :  { %3487 = vmatprep.subr.mxu0 %v3074_v60 }
0x1868   :  { %v2655_v23 = vpop.permute.xlu0 %2654 }
0x1869   :  { %v2670_v17 = vsel %vm441_vm2, %v2668_v16, %v2655_v23 }
0x186a   :  { %v3614_v52 = vpop.eup %3613 }
0x186b   :  { %v2556_v58 = vmul.f32 %v3614_v52, %v3610_v59 }
0x186e   :  { %v3616_v4 = vpop.eup %3615 }
0x186f   :  { %v2555_v5 = vmul.f32 %v3616_v4, %v3612_v47 }
0x1871   :  { %3484 = vmatprep.mubr.msk.f32.mxu0 %vm441_vm2, %v2555_v5  ;;  %v2796_v5 = vrot.slane %v4121_v14, %v1316_v40  ;;  %v3081_v40 = vld [vmem:[%s4390_s7 + $0x50] sm:$0xff] }
0x1872   :  { %3485 = vmatmul.mubr.msk.f32.vlgmr.msra.gmra.mxu0 %vm441_vm2, %v2556_v58 }
0x1873   :  { %3488 = vmatpush3.msra.mxu0 %v3074_v60 }
0x1874   :  { %3489 = vmatprep.subr.mxu0 %v3073_v8 }
0x1875   :  { %3490 = vmatpush3.msra.mxu0 %v3073_v8 }
0x1876   :  { %3491 = vmatprep.subr.mxu0 %v3072_v9 }
0x1877   :  { %3492 = vmatpush3.msra.mxu0 %v3072_v9 }
0x1878   :  { %3493 = vmatprep.subr.mxu0 %v3071_v10 }
0x1879   :  { %3494 = vmatpush3.msra.mxu0 %v3071_v10 }
0x187a   :  { %3509 = vmatprep.subr.mxu0 %v3086_v42 }
0x1932   :  { %v3486_v13 = vpop.f32.mrf.mxu0 }
0x1933   :  { %2664 = vrot.lane.b32.xlu1 %v3486_v13, %s3664_s24 }
0x1934   :  { %v2635_v61 = vpop.f32.mrf.mxu0 }
0x1935   :  { %2662 = vrot.lane.b32.xlu0 %v2635_v61, %s3664_s24  ;;  %v3080_v61 = vld [vmem:[%s4390_s7 + $0x48] sm:$0xff]  ;;  %s3665_s7 = smov [#allocation2]  }
0x1936   :  { %s3018_s0 = sshll.u32 %s3665_s7, 4  ;;  %s3019_s0 = int_to_ptr.vmem [resolvable:$true] %s3018_s0 }
0x1937   :  { %s3628_s28 = scalar_lea.vmem %s3019_s0, 256  ;;  %p3633_p1 = scmp.lt.s32.totalorder %s3019_s0, %s3019_s0 }
0x1938   :  { %p3629_p0 = scmp.ne.s32.totalorder %s3019_s0, %s3628_s28  ;;  %p3634_p2 = scmp.lt.s32.totalorder %s3628_s28, %s3628_s28 }
0x193a   :  { %p3635_p3 = por %p3634_p2, %p3633_p1 }
0x193c   :  { %p3636_p4 = pnand %p3635_p3, %p3629_p0 }
0x19a5   :  { %v2665_v19 = vpop.permute.xlu1 %2664 }
0x19a6   :  { %v2673_v7 = vsel %vm1191_vm3, %v2671_v20, %v2665_v19 }
0x19a7   :  { %v2663_v21 = vpop.permute.xlu0 %2662 }
0x19a8   :  { %v2672_v22 = vsel %vm1191_vm3, %v2670_v17, %v2663_v21  ;;  %v2889_v21 = vrot.slane %v4121_v14, %v1409_v62 }
0x19a9   :  { %3495 = vmatprep.mubr.msk.f32.mxu0 %vm71_vm0, %v2672_v22 }
0x19aa   :  { %3496 = vmatmul.mubr.msk.f32.vlgmr.msra.gmra.mxu0 %vm71_vm0, %v2673_v7 }
0x19ab   :  { %3510 = vmatpush3.msra.mxu0 %v3086_v42 }
0x19ac   :  { %3511 = vmatprep.subr.mxu0 %v3085_v41 }
0x19ad   :  { %3512 = vmatpush3.msra.mxu0 %v3085_v41 }
0x19ae   :  { %3513 = vmatprep.subr.mxu0 %v3084_v49 }
0x19af   :  { %3514 = vmatpush3.msra.mxu0 %v3084_v49 }
0x19b0   :  { %3515 = vmatprep.subr.mxu0 %v3083_v50 }
0x19b1   :  { %3516 = vmatpush3.msra.mxu0 %v3083_v50 }
0x19b2   :  { %3517 = vmatprep.subr.mxu0 %v3082_v39 }
0x19b3   :  { %3518 = vmatpush3.msra.mxu0 %v3082_v39 }
0x19b4   :  { %3519 = vmatprep.subr.mxu0 %v3081_v40 }
0x19b5   :  { %3520 = vmatpush3.msra.mxu0 %v3081_v40 }
0x19b6   :  { %3521 = vmatprep.subr.mxu0 %v3080_v61 }
0x19b7   :  { %3522 = vmatpush3.msra.mxu0 %v3080_v61 }
0x19b8   :  { %3523 = vmatprep.subr.mxu0 %v3079_v63 }
0x19b9   :  { %3524 = vmatpush3.msra.mxu0 %v3079_v63 }
0x1a6a   :  { %v3497_v2 = vpop.f32.mrf.mxu0 }
0x1a6b   :  { %v2756_v24 = vadd.f32 %v3497_v2, %v2677_v43 }
0x1a6c   :  { %v2750_v44 = vpop.f32.mrf.mxu0 }
0x1a6d   :  { %v2760_v34 = vadd.f32 %v2756_v24, %v4105_v57  ;;  %v2751_v1 = vadd.f32 %v2750_v44, %v2677_v43 }
0x1a6f   :  { %v2759_v15 = vadd.f32 %v2751_v1, %v4103_v56  ;;  %v2764_v25 = vsel %vm71_vm0, %v2760_v34, 0.0  ;;  %v3078_v56 = vld [vmem:[%s4389_s6 + $0x38] sm:$0xff] }
0x1a70   :  { %2765 = vadd.xlane.f32.xlu1 %v2764_v25  ;;  %3498 = vmatprep.subr.mxu1 %v3078_v56 }
0x1a71   :  { %v2761_v29 = vsel %vm71_vm0, %v2759_v15, 0.0  ;;  %3499 = vmatpush3.msra.mxu1 %v3078_v56  ;;  %v3002_v56 = vrot.slane %v4121_v14, %v1523_v45 }
0x1a72   :  { %2762 = vadd.xlane.f32.xlu0 %v2761_v29  ;;  %3500 = vmatprep.subr.mxu1 %v3077_v18 }
0x1a73   :  { %3501 = vmatpush3.msra.mxu1 %v3077_v18 }
0x1a74   :  { %3502 = vmatprep.subr.mxu1 %v3076_v37 }
0x1a75   :  { %3503 = vmatpush3.msra.mxu1 %v3076_v37 }
0x1a76   :  { %3504 = vmatprep.subr.mxu1 %v3075_v38 }
0x1a77   :  { %3505 = vmatpush3.msra.mxu1 %v3075_v38  ;;  %v3008_v38 = vrot.slane %v4121_v14, %v1529_v48 }
0x1af9   :  { %v2766_v11 = vpop.xlane.xlu1 %2765 }
0x1afa   :  { %v2768_v26 = vmul.f32 0.03125, %v2766_v11 }
0x1afb   :  { %v2763_v27 = vpop.xlane.xlu0 %2762 }
0x1afc   :  { %v2767_v30 = vmul.f32 0.03125, %v2763_v27  ;;  %v2770_v31 = vsub.f32 %v2760_v34, %v2768_v26 }
0x1afe   :  { %v2769_v6 = vsub.f32 %v2759_v15, %v2767_v30  ;;  %v2772_v35 = vmul.f32 %v2770_v31, %v2770_v31 }
0x1b00   :  { %v2771_v32 = vmul.f32 %v2769_v6, %v2769_v6  ;;  %v2776_v57 = vsel %vm71_vm0, %v2772_v35, 0.0 }
0x1b02   :  { %v2773_v33 = vsel %vm71_vm0, %v2771_v32, 0.0 }
0x1b03   :  { %2774 = vadd.xlane.f32.xlu0 %v2773_v33 }
0x1b07   :  { %2777 = vadd.xlane.f32.xlu0 %v2776_v57 }
0x1b8c   :  { %v2775_v59 = vpop.xlane.xlu0 %2774 }
0x1b8d   :  { %v2779_v51 = vmul.f32 0.03125, %v2775_v59 }
0x1b8f   :  { %v2781_v47 = vadd.f32 1e-05, %v2779_v51 }
0x1b90   :  { %v2778_v46 = vpop.xlane.xlu0 %2777 }
0x1b91   :  { %3617 = vrsqrt.f32 %v2781_v47  ;;  %v2780_v55 = vmul.f32 0.03125, %v2778_v46 }
0x1b93   :  { %v2782_v28 = vadd.f32 1e-05, %v2780_v55 }
0x1b95   :  { %3619 = vrsqrt.f32 %v2782_v28 }
0x1b9e   :  { %v3618_v52 = vpop.eup %3617 }
0x1b9f   :  { %v2785_v4 = vmul.f32 %v3618_v52, %v2769_v6 }
0x1ba1   :  { %v2791_v58 = vmul.f32 %v2790_v53, %v2785_v4 }
0x1ba2   :  { %v3620_v60 = vpop.eup %3619 }
0x1ba3   :  { %v2786_v8 = vmul.f32 %v3620_v60, %v2770_v31  ;;  %v2797_v9 = vadd.f32 %v2796_v5, %v2791_v58 }
0x1ba5   :  { %v2792_v10 = vmul.f32 %v2790_v53, %v2786_v8  ;;  %3506 = vmatprep.mubr.msk.f32.mxu1 %vm71_vm0, %v2797_v9 }
0x1ba7   :  { %v2798_v13 = vadd.f32 %v2796_v5, %v2792_v10 }
0x1ba9   :  { %3507 = vmatmul.mubr.msk.f32.vlgmr.msra.gmra.mxu1 %vm71_vm0, %v2798_v13 }
0x1c69   :  { %v3508_v3 = vpop.f32.mrf.mxu1 }
0x1c6a   :  { %v2881_v23 = vadd.f32 %v3508_v3, %v2802_v0 }
0x1c6b   :  { %v2875_v16 = vpop.f32.mrf.mxu1 }
0x1c6c   :  { %v2876_v19 = vadd.f32 %v2875_v16, %v2802_v0  ;;  %v2885_v17 = vmax.f32 %v2881_v23, 0.0 }
0x1c6e   :  { %v2884_v36 = vmax.f32 %v2876_v19, 0.0 }
0x1c70   :  { %3525 = vmatprep.mubr.msk.f32.mxu0 %vm1411_vm4, %v2884_v36 }
0x1c71   :  { %3526 = vmatmul.mubr.msk.f32.vlgmr.msra.gmra.mxu0 %vm1411_vm4, %v2885_v17 }
0x1d31   :  { %v3527_v20 = vpop.f32.mrf.mxu0 }
0x1d32   :  { %v2968_v22 = vadd.f32 %v3527_v20, %v2889_v21 }
0x1d33   :  { %v2962_v7 = vpop.f32.mrf.mxu0 }
0x1d34   :  { %v2972_v43 = vadd.f32 %v2968_v22, %v2798_v13  ;;  %v2963_v2 = vadd.f32 %v2962_v7, %v2889_v21 }
0x1d36   :  { %v2971_v54 = vadd.f32 %v2963_v2, %v2797_v9  ;;  %v2976_v24 = vsel %vm71_vm0, %v2972_v43, 0.0 }
0x1d37   :  { %2977 = vadd.xlane.f32.xlu0 %v2976_v24 }
0x1d38   :  { %v2973_v44 = vsel %vm71_vm0, %v2971_v54, 0.0 }
0x1d39   :  { %2974 = vadd.xlane.f32.xlu1 %v2973_v44 }
0x1dc0   :  { %v2978_v34 = vpop.xlane.xlu0 %2977 }
0x1dc1   :  { %v2980_v1 = vmul.f32 0.03125, %v2978_v34 }
0x1dc2   :  { %v2975_v15 = vpop.xlane.xlu1 %2974 }
0x1dc3   :  { %v2982_v25 = vsub.f32 %v2972_v43, %v2980_v1  ;;  %v2979_v29 = vmul.f32 0.03125, %v2975_v15 }
0x1dc5   :  { %v2981_v11 = vsub.f32 %v2971_v54, %v2979_v29  ;;  %v2984_v26 = vmul.f32 %v2982_v25, %v2982_v25 }
0x1dc7   :  { %v2988_v62 = vsel %vm71_vm0, %v2984_v26, 0.0  ;;  %v2983_v27 = vmul.f32 %v2981_v11, %v2981_v11 }
0x1dc8   :  { %2989 = vadd.xlane.f32.xlu0 %v2988_v62 }
0x1dc9   :  { %v2985_v30 = vsel %vm71_vm0, %v2983_v27, 0.0 }
0x1dca   :  { %2986 = vadd.xlane.f32.xlu1 %v2985_v30 }
0x1e51   :  { %v2990_v31 = vpop.xlane.xlu0 %2989 }
0x1e52   :  { %v2992_v6 = vmul.f32 0.03125, %v2990_v31 }
0x1e53   :  { %v2987_v32 = vpop.xlane.xlu1 %2986 }
0x1e54   :  { %v2994_v33 = vadd.f32 1e-05, %v2992_v6  ;;  %v2991_v35 = vmul.f32 0.03125, %v2987_v32 }
0x1e56   :  { %3621 = vrsqrt.f32 %v2994_v33  ;;  %v2993_v57 = vadd.f32 1e-05, %v2991_v35 }
0x1e58   :  { %3623 = vrsqrt.f32 %v2993_v57 }
0x1e63   :  { %v3622_v18 = vpop.eup %3621 }
0x1e64   :  { %v2998_v37 = vmul.f32 %v3622_v18, %v2982_v25 }
0x1e65   :  { %v3624_v42 = vpop.eup %3623 }
0x1e66   :  { %v2997_v41 = vmul.f32 %v3624_v42, %v2981_v11  ;;  %v3004_v49 = vmul.f32 %v3002_v56, %v2998_v37 }
0x1e68   :  { %v3003_v50 = vmul.f32 %v3002_v56, %v2997_v41  ;;  %v3010_v59 = vadd.f32 %v3008_v38, %v3004_v49 }
0x1e6a   :  { %v3009_v51 = vadd.f32 %v3008_v38, %v3003_v50  ;;  %3012 = vst.msk [vmem:[#allocation2 + $0x8] sm:$0xff] %vm71_vm0, %v3010_v59 }
0x1e6c   :  { %3011 = vst.msk [vmem:[#allocation2] sm:$0xff] %vm71_vm0, %v3009_v51 }
0x1e6d   :  { %3639 = shalt.err (!%p3636_p4)
}
0x1e6e   :  { %s3666_s29 = smov 128  }
0x1e6f   :  { %3024 = dma.vmem_to_hbm [thread:$0]  %s3019_s0, 256, %s4392_s9, [#allocation3], %s3666_s29, %s3666_s29, %s3662_s11  }
0x1e70   :  { %3648 = dma.done.wait [#allocation3], 256  }
0x1e71   :  { %3649 = vsyncadd [#allocation3], 4294967040 }
0x1e72   :  { %3028 = vsyncpa [#allocation3], 1 }

</bundles_post_ra>
